<compile_context>
chip_gen: v7x
topology: tpu7x:2x2x1
jax: 0.10.0
libtpu: 0.0.40
codegen_flags: <defaults>
</compile_context>

<pallas_src>
import functools

import jax
import jax.numpy as jnp
import numpy as np
from jax import lax
from jax.experimental import pallas as pl

# Small, module-consistent configuration (scaled-down n_embd / block_size), chosen so that
# C and H*hs are multiples of 128 (lane-dense) and B*T is a multiple of 8 (sublane-dense).
N_EMBD = 128
NUM_HEADS = 4
HEAD_SIZE = 32          # head_size * num_heads == n_embd, matching the usual GPT setup
SEQ_LEN = 16            # T <= block_size; causal (tril) mask applied over T x T
BATCH = 2


def mha_kernel(x_ref, wqkv_ref, wp_ref, bp_ref, o_ref,
               *, batch, seq, num_heads, head_size):
    """Whole-batch multi-head causal self-attention + output projection (eval mode)."""
    hidden = num_heads * head_size

    x = x_ref[...]                                            # (B*T, C) bf16

    # One fused QKV projection: lane-dense (B*T, C) @ (C, 3*hidden), f32 accumulation.
    # The 1/sqrt(head_size) scale is already folded into the Q columns (wrapper).
    qkv = jnp.dot(x, wqkv_ref[...],
                  preferred_element_type=jnp.float32)         # (B*T, 3*hidden) f32
    qkv = qkv.astype(jnp.bfloat16)                            # bf16 operands for the MXU

    def split_heads(z2d):
        # (B*T, hidden) -> (B*H, T, hs); 128-aligned lane slices upstream, no per-head
        # sub-vreg lane shifts.
        z = z2d.reshape(batch, seq, num_heads, head_size)
        return jnp.swapaxes(z, 1, 2).reshape(batch * num_heads, seq, head_size)

    q = split_heads(qkv[:, :hidden])                          # (B*H, T, hs)
    k = split_heads(qkv[:, hidden:2 * hidden])
    v = split_heads(qkv[:, 2 * hidden:])

    # All-head scores in one batched einsum; contraction over the last dims, so no
    # explicit K transpose / extra XLU traffic.
    s = jnp.einsum('gqd,gkd->gqk', q, k,
                   preferred_element_type=jnp.float32)        # (B*H, T, T) f32

    # Causal (tril) mask.  Large finite negative rather than -inf: robust even if a row
    # were ever fully masked (padding/segment reuse), exp() still yields exact 0.
    row = lax.broadcasted_iota(jnp.int32, (seq, seq), 0)
    col = lax.broadcasted_iota(jnp.int32, (seq, seq), 1)
    neg = jnp.float32(jnp.finfo(jnp.float32).min) * 0.5
    s = jnp.where(col <= row, s, neg)

    # Manual f32 softmax; the approximate reciprocal lands on the otherwise-idle EUP slot.
    m = jnp.max(s, axis=-1, keepdims=True)
    e = jnp.exp(s - m)
    l = jnp.sum(e, axis=-1, keepdims=True)
    p = e * pl.reciprocal(l, approx=True)
    # TODO(synk): training-mode dropout on attention weights omitted (eval semantics).

    # P @ V for all heads in one batched einsum, then merge heads (layout reshape only —
    # replaces the explicit per-head concatenate of the PyTorch module).
    pv = jnp.einsum('gqk,gkd->gqd', p.astype(jnp.bfloat16), v,
                    preferred_element_type=jnp.float32)       # (B*H, T, hs)
    pv = pv.reshape(batch, num_heads, seq, head_size)
    pv = jnp.swapaxes(pv, 1, 2).reshape(batch * seq, hidden)  # (B*T, hidden)

    # Single output projection over the full contraction depth (K = hidden), bf16 in /
    # f32 accumulate, plus bias.
    out = jnp.dot(pv.astype(jnp.bfloat16), wp_ref[...],
                  preferred_element_type=jnp.float32)         # (B*T, C)
    out = out + bp_ref[...].astype(jnp.float32)
    # TODO(synk): training-mode dropout on the projected output omitted (eval semantics).

    o_ref[...] = out.astype(o_ref.dtype)


def multi_head_attention(x, wq, wk, wv, wp, bp, *, num_heads, head_size):
    B, T, C = x.shape
    hidden = num_heads * head_size

    # Fold the attention scale into the Q columns (done once, outside the kernel) and
    # column-stack Q|K|V into one weight so the kernel does a single fused QKV matmul
    # with a single weight DMA.  Weights/activations are fed to the kernel as bf16
    # (halves DMA bytes, matches the MXU's rated input dtype); accumulation stays f32.
    scale = head_size ** (-0.5)
    wqkv = jnp.concatenate([wq * scale, wk, wv], axis=1).astype(jnp.bfloat16)
    wp_b = wp.astype(jnp.bfloat16)
    x2 = x.reshape(B * T, C).astype(jnp.bfloat16)             # free layout-preserving reshape

    # Advisory cost estimate so XLA can schedule around the custom call.
    flops = (2 * (B * T) * C * (3 * hidden)            # fused QKV projection
             + 2 * (B * num_heads) * T * T * head_size  # QK^T
             + 2 * (B * num_heads) * T * T * head_size  # P @ V
             + 2 * (B * T) * hidden * C)                # output projection
    transcendentals = B * num_heads * T * T             # exp in softmax
    bytes_accessed = (x2.size * 2 + wqkv.size * 2 + wp_b.size * 2
                      + bp.size * 4 + (B * T) * C * 4)

    kernel = functools.partial(mha_kernel, batch=B, seq=T,
                               num_heads=num_heads, head_size=head_size)

    # Single grid-less invocation: the full working set is a few hundred KiB, far below
    # VMEM on every generation, and per-grid-step pipeline overhead would dominate at
    # these shapes.  See the header comment for the flash-style tiled-grid plan (and the
    # v7x two-TensorCore "parallel" axis) to use at real GPT sizes.
    out2 = pl.pallas_call(
        kernel,
        out_shape=jax.ShapeDtypeStruct((B * T, C), jnp.float32),
        in_specs=[
            pl.BlockSpec((B * T, C), lambda: (0, 0)),          # x (flattened batch)
            pl.BlockSpec((C, 3 * hidden), lambda: (0, 0)),     # Wqkv (stacked Q|K|V heads)
            pl.BlockSpec((hidden, C), lambda: (0, 0)),         # W_proj
            pl.BlockSpec((1, C), lambda: (0, 0)),              # b_proj
        ],
        out_specs=pl.BlockSpec((B * T, C), lambda: (0, 0)),
        cost_estimate=pl.CostEstimate(flops=flops,
                                      transcendentals=transcendentals,
                                      bytes_accessed=bytes_accessed),
    )(x2, wqkv, wp_b, bp)
    return out2.reshape(B, T, C)


def reference_mha(x, wq, wk, wv, wp, bp, *, num_heads, head_size):
    """Pure-JAX f32 reference mirroring the PyTorch forward (eval mode)."""
    B, T, C = x.shape
    tril = jnp.tril(jnp.ones((T, T), dtype=bool))
    outs = []
    for h in range(num_heads):
        s = h * head_size
        q = x @ wq[:, s:s + head_size]
        k = x @ wk[:, s:s + head_size]
        v = x @ wv[:, s:s + head_size]
        wei = q @ jnp.swapaxes(k, -2, -1) * head_size ** (-0.5)
        wei = jnp.where(tril, wei, -jnp.inf)
        wei = jax.nn.softmax(wei, axis=-1)
        outs.append(wei @ v)
    cat = jnp.concatenate(outs, axis=-1)
    return cat @ wp + bp[0]


if __name__ == "__main__":
    key = jax.random.PRNGKey(0)
    kx, kq, kk, kv, kp, kb = jax.random.split(key, 6)

    hidden = NUM_HEADS * HEAD_SIZE
    x = jax.random.normal(kx, (BATCH, SEQ_LEN, N_EMBD), dtype=jnp.float32)
    # Deterministic "PyTorch-Linear-like" init (uniform in +/- 1/sqrt(fan_in)).
    wq = jax.random.uniform(kq, (N_EMBD, hidden), jnp.float32, -1.0, 1.0) * (N_EMBD ** -0.5)
    wk = jax.random.uniform(kk, (N_EMBD, hidden), jnp.float32, -1.0, 1.0) * (N_EMBD ** -0.5)
    wv = jax.random.uniform(kv, (N_EMBD, hidden), jnp.float32, -1.0, 1.0) * (N_EMBD ** -0.5)
    wp = jax.random.uniform(kp, (hidden, N_EMBD), jnp.float32, -1.0, 1.0) * (hidden ** -0.5)
    bp = jax.random.uniform(kb, (1, N_EMBD), jnp.float32, -1.0, 1.0) * (hidden ** -0.5)

    out = multi_head_attention(x, wq, wk, wv, wp, bp,
                               num_heads=NUM_HEADS, head_size=HEAD_SIZE)
    out = jax.block_until_ready(out)

    ref = reference_mha(x, wq, wk, wv, wp, bp,
                        num_heads=NUM_HEADS, head_size=HEAD_SIZE)
    # Tolerance absorbs bf16 MXU inputs + the approximate EUP reciprocal in the softmax
    # (inference-mode precision; reference is pure f32).
    np.testing.assert_allclose(np.asarray(out), np.asarray(ref), rtol=2e-2, atol=2e-2)

    print("KERNEL_OK")
</pallas_src>

<mosaic_0001>
module attributes {stable_mosaic.version = 11 : i64} {
  func.func @mha_kernel(%arg0: memref<32x128xbf16, #tpu.memory_space<vmem>>, %arg1: memref<128x384xbf16, #tpu.memory_space<vmem>>, %arg2: memref<128x128xbf16, #tpu.memory_space<vmem>>, %arg3: memref<1x128xf32, #tpu.memory_space<vmem>>, %arg4: memref<32x128xf32, #tpu.memory_space<vmem>>) attributes {dimension_semantics = [], scalar_prefetch = 0 : i64, scratch_operands = 0 : i64, tpu.core_type = #tpu.core_type<tc>} {
    %c0 = arith.constant 0 : index
    %c0_0 = arith.constant 0 : index
    %0 = vector.load %arg0[%c0, %c0_0] : memref<32x128xbf16, #tpu.memory_space<vmem>>, vector<32x128xbf16>
    %c0_1 = arith.constant 0 : index
    %c0_2 = arith.constant 0 : index
    %1 = vector.load %arg1[%c0_1, %c0_2] : memref<128x384xbf16, #tpu.memory_space<vmem>>, vector<128x384xbf16>
    %cst = arith.constant dense<0.000000e+00> : vector<32x384xf32>
    %2 = tpu.matmul %0, %1, %cst {dimension_numbers = #tpu.dot_dimension_numbers<[1], [0], [0], [1], [0, 0, 1, 1], [], []>} : vector<32x128xbf16>, vector<128x384xbf16>, vector<32x384xf32> -> vector<32x384xf32>
    %3 = arith.truncf %2 : vector<32x384xf32> to vector<32x384xbf16>
    %4 = vector.extract_strided_slice %3 {offsets = [0, 0], sizes = [32, 128], strides = [1, 1]} : vector<32x384xbf16> to vector<32x128xbf16>
    %5 = vector.shape_cast %4 : vector<32x128xbf16> to vector<2x16x4x32xbf16>
    %6 = tpu.transpose %5, [0, 2, 1, 3] : vector<2x16x4x32xbf16> -> vector<2x4x16x32xbf16>
    %7 = vector.shape_cast %6 : vector<2x4x16x32xbf16> to vector<8x16x32xbf16>
    %8 = vector.extract_strided_slice %3 {offsets = [0, 128], sizes = [32, 128], strides = [1, 1]} : vector<32x384xbf16> to vector<32x128xbf16>
    %9 = vector.shape_cast %8 : vector<32x128xbf16> to vector<2x16x4x32xbf16>
    %10 = tpu.transpose %9, [0, 2, 1, 3] : vector<2x16x4x32xbf16> -> vector<2x4x16x32xbf16>
    %11 = vector.shape_cast %10 : vector<2x4x16x32xbf16> to vector<8x16x32xbf16>
    %12 = vector.extract_strided_slice %3 {offsets = [0, 256], sizes = [32, 128], strides = [1, 1]} : vector<32x384xbf16> to vector<32x128xbf16>
    %13 = vector.shape_cast %12 : vector<32x128xbf16> to vector<2x16x4x32xbf16>
    %14 = tpu.transpose %13, [0, 2, 1, 3] : vector<2x16x4x32xbf16> -> vector<2x4x16x32xbf16>
    %15 = vector.shape_cast %14 : vector<2x4x16x32xbf16> to vector<8x16x32xbf16>
    "tpu.trace_start"() <{level = 10 : i32, message = "gqd,gkd->gqk"}> : () -> ()
    %cst_3 = arith.constant dense<0.000000e+00> : vector<8x16x16xf32>
    %16 = tpu.matmul %7, %11, %cst_3 {dimension_numbers = #tpu.dot_dimension_numbers<[2], [2], [1], [1], [0, 0, 0, 1, 1, 1], [0], [0]>} : vector<8x16x32xbf16>, vector<8x16x32xbf16>, vector<8x16x16xf32> -> vector<8x16x16xf32>
    "tpu.trace_stop"() : () -> ()
    %17 = tpu.iota {dimensions = array<i32: 0>} : vector<16x16xi32>
    %18 = tpu.iota {dimensions = array<i32: 1>} : vector<16x16xi32>
    %cst_4 = arith.constant -3.40282347E+38 : f32
    %cst_5 = arith.constant 5.000000e-01 : f32
    %19 = arith.mulf %cst_4, %cst_5 : f32
    %20 = arith.cmpi sle, %18, %17 : vector<16x16xi32>
    %21 = vector.shape_cast %20 : vector<16x16xi1> to vector<1x16x16xi1>
    %22 = vector.broadcast %21 : vector<1x16x16xi1> to vector<8x16x16xi1>
    %23 = vector.broadcast %19 : f32 to vector<8x16x16xf32>
    %24 = arith.select %22, %16, %23 : vector<8x16x16xi1>, vector<8x16x16xf32>
    %cst_6 = arith.constant dense<0xFF800000> : vector<8x16xf32>
    %25 = vector.multi_reduction <maximumf>, %24, %cst_6 [2] : vector<8x16x16xf32> to vector<8x16xf32>
    %26 = vector.shape_cast %25 : vector<8x16xf32> to vector<8x16x1xf32>
    %27 = vector.broadcast %26 : vector<8x16x1xf32> to vector<8x16x16xf32>
    %28 = arith.subf %24, %27 : vector<8x16x16xf32>
    %29 = math.exp %28 : vector<8x16x16xf32>
    %cst_7 = arith.constant dense<0.000000e+00> : vector<8x16xf32>
    %30 = vector.multi_reduction <add>, %29, %cst_7 [2] : vector<8x16x16xf32> to vector<8x16xf32>
    %31 = vector.shape_cast %30 : vector<8x16xf32> to vector<8x16x1xf32>
    %32 = tpu.reciprocal %31 {approx = true} : vector<8x16x1xf32> -> vector<8x16x1xf32>
    %33 = vector.broadcast %32 : vector<8x16x1xf32> to vector<8x16x16xf32>
    %34 = arith.mulf %29, %33 : vector<8x16x16xf32>
    %35 = arith.truncf %34 : vector<8x16x16xf32> to vector<8x16x16xbf16>
    "tpu.trace_start"() <{level = 10 : i32, message = "gqk,gkd->gqd"}> : () -> ()
    %cst_8 = arith.constant dense<0.000000e+00> : vector<8x16x32xf32>
    %36 = tpu.matmul %35, %15, %cst_8 {dimension_numbers = #tpu.dot_dimension_numbers<[2], [1], [1], [2], [0, 0, 0, 1, 1, 2], [0], [0]>} : vector<8x16x16xbf16>, vector<8x16x32xbf16>, vector<8x16x32xf32> -> vector<8x16x32xf32>
    "tpu.trace_stop"() : () -> ()
    %37 = vector.shape_cast %36 : vector<8x16x32xf32> to vector<2x4x16x32xf32>
    %38 = tpu.transpose %37, [0, 2, 1, 3] : vector<2x4x16x32xf32> -> vector<2x16x4x32xf32>
    %39 = vector.shape_cast %38 : vector<2x16x4x32xf32> to vector<32x128xf32>
    %40 = arith.truncf %39 : vector<32x128xf32> to vector<32x128xbf16>
    %c0_9 = arith.constant 0 : index
    %c0_10 = arith.constant 0 : index
    %41 = vector.load %arg2[%c0_9, %c0_10] : memref<128x128xbf16, #tpu.memory_space<vmem>>, vector<128x128xbf16>
    %cst_11 = arith.constant dense<0.000000e+00> : vector<32x128xf32>
    %42 = tpu.matmul %40, %41, %cst_11 {dimension_numbers = #tpu.dot_dimension_numbers<[1], [0], [0], [1], [0, 0, 1, 1], [], []>} : vector<32x128xbf16>, vector<128x128xbf16>, vector<32x128xf32> -> vector<32x128xf32>
    %c0_12 = arith.constant 0 : index
    %c0_13 = arith.constant 0 : index
    %43 = vector.load %arg3[%c0_12, %c0_13] : memref<1x128xf32, #tpu.memory_space<vmem>>, vector<1x128xf32>
    %44 = vector.broadcast %43 : vector<1x128xf32> to vector<32x128xf32>
    %45 = arith.addf %42, %44 : vector<32x128xf32>
    %c0_14 = arith.constant 0 : index
    %c0_15 = arith.constant 0 : index
    %46 = vector.load %arg4[%c0_14, %c0_15] : memref<32x128xf32, #tpu.memory_space<vmem>>, vector<32x128xf32>
    tpu.vector_store %arg4[%c0_14, %c0_15], %45 {strides = array<i32>} : memref<32x128xf32, #tpu.memory_space<vmem>>, vector<32x128xf32>,
    return
  }
}

</mosaic_0001>

<bundles_post_ra>
// kernel: tpu_custom_call.1
= control target key start
LH: loop header
LB: loop body
LE: loop exit
PB: predicated region body
PF: predicated region fallthrough
CT: control target
= control target key end

     0   :  { %9 = vsyncpa [#allocation3], 0  ;;  %s5010_s0 = inlined_call_operand.hbm [shape: bf16[32,128], index: 0, kind: input, shape index: {}]   ;;  %s5011_s1 = inlined_call_operand.hbm [shape: bf16[128,384], index: 1, kind: input, shape index: {}]   ;;  %s5012_s2 = inlined_call_operand.hbm [shape: bf16[128,128], index: 2, kind: input, shape index: {}]   ;;  %s5013_s3 = inlined_call_operand.vmem [shape: f32[1,128], index: 3, kind: input, shape index: {}]   ;;  %s5014_s4 = inlined_call_operand.hbm [shape: f32[32,128], index: 4, kind: output, shape index: {}]  }
   0x1   :  { %10 = vsyncpa [#allocation6], 0 }
   0x2   :  { %11 = vsyncpa [#allocation4], 0  ;;  %s4169_s15 = smov [#allocation5]   ;;  %s4075_s19 = scalar_lea.hbm %s5011_s1, 3072 }
   0x3   :  { %s29_s16 = sshll.u32 %s4169_s15, 4  ;;  %p4076_p0 = scmp.ne.s32.totalorder %s5011_s1, %s4075_s19  ;;  %s30_s16 = int_to_ptr.vmem [resolvable:$true] %s29_s16 }
   0x4   :  { %p4079_p1 = scmp.lt.u32.totalorder %s4075_s19, %s5011_s1 }
   0x6   :  { %p4081_p2 = pnand %p4079_p1, %p4076_p0 }
   0x8   :  { %4084 = shalt.err (!%p4081_p2)
}
   0x9   :  { %s4085_s24 = scalar_lea.vmem %s30_s16, 3072  ;;  %p4090_p4 = scmp.lt.s32.totalorder %s30_s16, %s30_s16 }
   0xa   :  { %p4086_p3 = scmp.ne.s32.totalorder %s30_s16, %s4085_s24  ;;  %p4091_p5 = scmp.lt.s32.totalorder %s4085_s24, %s4085_s24 }
   0xc   :  { %p4092_p6 = por %p4091_p5, %p4090_p4 }
   0xe   :  { %p4093_p7 = pnand %p4092_p6, %p4086_p3 }
  0x10   :  { %4096 = shalt.err (!%p4093_p7)
}
  0x11   :  { %s4170_s25 = smov 192   ;;  %s4171_s26 = smov 12  }
  0x12   :  { %35 = dma.hbm_to_vmem [thread:$0]  %s5011_s1, 3072, %s30_s16, [#allocation6], %s4170_s25, %s4170_s25, %s4171_s26  }
  0x13   :  { %s4172_s29 = smov [#allocation2]   ;;  %s4097_s7 = scalar_lea.hbm %s5010_s0, 256 }
  0x14   :  { %s17_s30 = sshll.u32 %s4172_s29, 4  ;;  %p4098_p8 = scmp.ne.s32.totalorder %s5010_s0, %s4097_s7  ;;  %s18_s30 = int_to_ptr.vmem [resolvable:$true] %s17_s30 }
  0x15   :  { %p4101_p9 = scmp.lt.u32.totalorder %s4097_s7, %s5010_s0 }
  0x17   :  { %p4103_p10 = pnand %p4101_p9, %p4098_p8 }
  0x19   :  { %4106 = shalt.err (!%p4103_p10)
}
  0x1a   :  { %s4107_s12 = scalar_lea.vmem %s18_s30, 256  ;;  %p4112_p12 = scmp.lt.s32.totalorder %s18_s30, %s18_s30 }
  0x1b   :  { %p4108_p11 = scmp.ne.s32.totalorder %s18_s30, %s4107_s12  ;;  %p4113_p13 = scmp.lt.s32.totalorder %s4107_s12, %s4107_s12 }
  0x1d   :  { %p4114_p0 = por %p4113_p13, %p4112_p12 }
  0x1f   :  { %p4115_p1 = pnand %p4114_p0, %p4108_p11 }
  0x21   :  { %4118 = shalt.err (!%p4115_p1)
}
  0x22   :  { %s4173_s1 = smov 64   ;;  %s4174_s13 = smov 4  }
  0x23   :  { %23 = dma.hbm_to_vmem [thread:$0]  %s5010_s0, 256, %s18_s30, [#allocation3], %s4173_s1, %s4173_s1, %s4174_s13  }
  0x24   :  { %s4175_s16 = smov [#allocation7]   ;;  %s4119_s20 = scalar_lea.hbm %s5012_s2, 1024 }
  0x25   :  { %s41_s17 = sshll.u32 %s4175_s16, 4  ;;  %p4120_p2 = scmp.ne.s32.totalorder %s5012_s2, %s4119_s20  ;;  %s42_s17 = int_to_ptr.vmem [resolvable:$true] %s41_s17 }
  0x26   :  { %p4123_p3 = scmp.lt.u32.totalorder %s4119_s20, %s5012_s2 }
  0x28   :  { %p4125_p4 = pnand %p4123_p3, %p4120_p2 }
  0x2a   :  { %4128 = shalt.err (!%p4125_p4)
}
  0x2b   :  { %s4129_s25 = scalar_lea.vmem %s42_s17, 1024  ;;  %p4134_p6 = scmp.lt.s32.totalorder %s42_s17, %s42_s17 }
  0x2c   :  { %p4130_p5 = scmp.ne.s32.totalorder %s42_s17, %s4129_s25  ;;  %p4135_p7 = scmp.lt.s32.totalorder %s4129_s25, %s4129_s25 }
  0x2e   :  { %p4136_p8 = por %p4135_p7, %p4134_p6 }
  0x30   :  { %p4137_p9 = pnand %p4136_p8, %p4130_p5 }
  0x32   :  { %4140 = shalt.err (!%p4137_p9)
}
  0x33   :  { %47 = dma.hbm_to_vmem [thread:$0]  %s5012_s2, 1024, %s42_s17, [#allocation6], %s4173_s1, %s4173_s1, %s4174_s13  }
  0x34   :  { %4163 = dma.done.wait [#allocation3], 256  }
  0x35   :  { %4164 = vsyncadd [#allocation3], 4294967040 }
  0x36   :  { %4165 = dma.done.wait [#allocation6], 4096  }
  0x37   :  { %4166 = vsyncadd [#allocation6], 4294963200  ;;  %v4176_v0 = vmov 0   ;;  %v3969_v1 = vld [vmem:[#allocation5 + $0x4] ss:$12 sps:$4 sm:$0xff]   ;;  %v3994_v18 = vld [vmem:[#allocation2 + $0x8] sm:$0xff]   ;;  %v400_v42 = vlaneseq }
  0x38   :  { %268 = vmatprep.mubr.bf16.mxu0 %v4176_v0  ;;  %v3971_v2 = vld [vmem:[#allocation5] ss:$12 sps:$4 sm:$0xff]   ;;  %236 = vmatprep.subr.bf16.mxu0 %v3969_v1  ;;  %v3972_v3 = vld [vmem:[#allocation5 + $0x1c] ss:$12 sps:$4 sm:$0xff]   ;;  %v3974_v4 = vld [vmem:[#allocation5 + $0x18] ss:$12 sps:$4 sm:$0xff]   ;;  %v4291_v49 = vpack.i.b16 %v4176_v0, %v4176_v0 }
  0x39   :  { %237 = vmatpush1.bf16.msra.mxu0 %v3971_v2  ;;  %v3975_v5 = vld [vmem:[#allocation5 + $0x34] ss:$12 sps:$4 sm:$0xff]   ;;  %v3977_v6 = vld [vmem:[#allocation5 + $0x30] ss:$12 sps:$4 sm:$0xff]   ;;  %v3978_v7 = vld [vmem:[#allocation5 + $0x4c] ss:$12 sps:$4 sm:$0xff]  }
  0x3a   :  { %238 = vmatprep.subr.bf16.mxu0 %v3972_v3  ;;  %v3980_v8 = vld [vmem:[#allocation5 + $0x48] ss:$12 sps:$4 sm:$0xff]   ;;  %v3981_v10 = vld [vmem:[#allocation5 + $0x64] ss:$12 sps:$4 sm:$0xff]   ;;  %v3983_v11 = vld [vmem:[#allocation5 + $0x60] ss:$12 sps:$4 sm:$0xff]  }
  0x3b   :  { %v3993_v9 = vld [vmem:[#allocation2] sm:$0xff]   ;;  %v3984_v12 = vld [vmem:[#allocation5 + $0x7c] ss:$12 sps:$4 sm:$0xff]   ;;  %v3986_v13 = vld [vmem:[#allocation5 + $0x78] ss:$12 sps:$4 sm:$0xff]   ;;  %s4177_s2 = smov 32  }
  0x3c   :  { %3802 = vmatprep.mubr.bf16.mxu1 %v3993_v9  ;;  %v3987_v14 = vld [vmem:[#allocation5 + $0x94] ss:$12 sps:$4 sm:$0xff]   ;;  %v3989_v15 = vld [vmem:[#allocation5 + $0x90] ss:$12 sps:$4 sm:$0xff]   ;;  %v3990_v16 = vld [vmem:[#allocation5 + $0xac] ss:$12 sps:$4 sm:$0xff]  }
  0x3d   :  { %239 = vmatpush1.bf16.msra.mxu0 %v3974_v4  ;;  %v3992_v17 = vld [vmem:[#allocation5 + $0xa8] ss:$12 sps:$4 sm:$0xff]   ;;  %v3996_v20 = vld [vmem:[#allocation5 + $0x20] ss:$12 sps:$4 sm:$0xff]   ;;  %v3997_v21 = vld [vmem:[#allocation5 + $0x38] ss:$12 sps:$4 sm:$0xff]  }
  0x3e   :  { %240 = vmatprep.subr.bf16.mxu0 %v3975_v5  ;;  %v3995_v19 = vld [vmem:[#allocation5 + $0x8] ss:$12 sps:$4 sm:$0xff]   ;;  %v3998_v22 = vld [vmem:[#allocation5 + $0x50] ss:$12 sps:$4 sm:$0xff]   ;;  %s4178_s27 = smov 96   ;;  %v4179_v39 = vmov 0.0  }
  0x3f   :  { %3786 = vmatprep.subr.bf16.mxu1 %v3995_v19  ;;  %v3999_v25 = vld [vmem:[#allocation5 + $0x68] ss:$12 sps:$4 sm:$0xff]   ;;  %v4000_v32 = vld [vmem:[#allocation5 + $0x80] ss:$12 sps:$4 sm:$0xff]   ;;  %v4001_v37 = vld [vmem:[#allocation5 + $0x98] ss:$12 sps:$4 sm:$0xff]  }
  0x40   :  { %3787 = vmatpush3.bf16.msra.mxu1 %v3995_v19  ;;  %v4002_v38 = vld [vmem:[#allocation5 + $0xb0] ss:$12 sps:$4 sm:$0xff]   ;;  %vm4180_vm0 = vmmov 0   ;;  %v4181_v40 = vmov 1983009808   ;;  %v4287_v46 = vshrl.u32 %v400_v42, 7 }
  0x41   :  { %241 = vmatpush1.bf16.msra.mxu0 %v3977_v6  ;;  %3788 = vmatprep.subr.bf16.mxu1 %v3996_v20  ;;  %v398_v41 = vunpack.c.l.s4 %v4181_v40  ;;  %v4182_v47 = vmov 1934713408   ;;  %vm1960_vm1 = vcmask 261120   ;;  %vm2364_vm3 = vcmask 130048   ;;  %s4183_s30 = smov [#allocation8]  }
  0x42   :  { %242 = vmatprep.subr.bf16.mxu0 %v3978_v7  ;;  %v429_v48 = vunpack.c.l.s4 %v4182_v47  ;;  %vm3497_vm5 = vcmask 523264   ;;  %vm3502_vm6 = vcmask 785408   ;;  %s3638_s5 = sshll.u32 %s4183_s30, 4  ;;  %s3639_s5 = int_to_ptr.vmem [resolvable:$true] %s3638_s5 }
  0x43   :  { %v399_v45 = vunpack.c.0.s8 %v398_v41  ;;  %s4141_s6 = scalar_lea.vmem %s3639_s5, 512  ;;  %p4146_p11 = scmp.lt.s32.totalorder %s3639_s5, %s3639_s5 }
  0x44   :  { %3789 = vmatpush3.bf16.msra.mxu1 %v3996_v20  ;;  %v430_v61 = vunpack.c.0.s8 %v429_v48  ;;  %p4142_p10 = scmp.ne.s32.totalorder %s3639_s5, %s4141_s6  ;;  %p4147_p12 = scmp.lt.s32.totalorder %s4141_s6, %s4141_s6 }
  0x45   :  { %243 = vmatpush1.bf16.msra.mxu0 %v3980_v8  ;;  %3790 = vmatprep.subr.bf16.mxu1 %v3997_v21  ;;  %v4294_v59 = vsub.s32 %v399_v45, %v4287_v46 }
  0x46   :  { %244 = vmatprep.subr.bf16.mxu0 %v3981_v10  ;;  %p4148_p13 = por %p4147_p12, %p4146_p11 }
  0x48   :  { %3791 = vmatpush3.bf16.msra.mxu1 %v3997_v21  ;;  %p4149_p0 = pnand %p4148_p13, %p4142_p10 }
  0x49   :  { %245 = vmatpush1.bf16.msra.mxu0 %v3983_v11  ;;  %3792 = vmatprep.subr.bf16.mxu1 %v3998_v22 }
  0x4a   :  { %246 = vmatprep.subr.bf16.mxu0 %v3984_v12 }
  0x4c   :  { %3793 = vmatpush3.bf16.msra.mxu1 %v3998_v22 }
  0x4d   :  { %247 = vmatpush1.bf16.msra.mxu0 %v3986_v13  ;;  %3794 = vmatprep.subr.bf16.mxu1 %v3999_v25 }
  0x4e   :  { %248 = vmatprep.subr.bf16.mxu0 %v3987_v14 }
  0x50   :  { %3795 = vmatpush3.bf16.msra.mxu1 %v3999_v25 }
  0x51   :  { %249 = vmatpush1.bf16.msra.mxu0 %v3989_v15  ;;  %3796 = vmatprep.subr.bf16.mxu1 %v4000_v32  ;;  %v4307_v15 = vsub.s32 %v430_v61, %v4287_v46 }
  0x52   :  { %250 = vmatprep.subr.bf16.mxu0 %v3990_v16 }
  0x54   :  { %3797 = vmatpush3.bf16.msra.mxu1 %v4000_v32 }
  0x55   :  { %251 = vmatpush1.bf16.msra.mxu0 %v3992_v17  ;;  %3798 = vmatprep.subr.bf16.mxu1 %v4001_v37 }
  0x56   :  { %3806 = vmatprep.subr.bf16.mxu0 %v4179_v39 }
  0x58   :  { %269 = vmatmul.mubr.bf16.vlgmr.msra.gmra.mrb[0].mxu0 %v3993_v9  ;;  %3799 = vmatpush3.bf16.msra.mxu1 %v4001_v37 }
  0x59   :  { %278 = vmatprep.mubr.bf16.mxu0 %v4176_v0  ;;  %3800 = vmatprep.subr.bf16.mxu1 %v4002_v38 }
  0x5c   :  { %3801 = vmatpush3.bf16.msra.mxu1 %v4002_v38 }
  0x5d   :  { %3818 = vmatprep.subr.bf16.mxu1 %v4179_v39 }
  0x5f   :  { %3803 = vmatmul.mubr.bf16.vlgmr.msra.gmra.mrb[0].mxu1 %v3994_v18 }
  0x60   :  { %279 = vmatmul.mubr.bf16.gmra.mrb[4].mxu0 %v3994_v18  ;;  %3820 = vmatprep.mubr.msk.bf16.mxu1 %vm4180_vm0, %v4179_v39 }
  0x61   :  { %3808 = vmatprep.mubr.msk.bf16.mxu0 %vm4180_vm0, %v4179_v39 }
 0x12b   :  { %v270_v23 = vpop.f32.mrb[0].mxu0 }
 0x12c   :  { %v272_v24 = vpop.f32.mrb[1].mxu0 }
 0x12d   :  { %v274_v26 = vpop.f32.mrb[2].mxu0 }
 0x12e   :  { %v4253_v27 = vpack.c.bf16 %v274_v26, %v270_v23  ;;  %v276_v28 = vpop.f32.mrb[3].mxu0 }
 0x12f   :  { %v339_v29 = vpack.c.bf16 %v276_v28, %v272_v24 }
 0x130   :  { %v362_v60 = vshrl.u32 %v4253_v27, 16 }
 0x131   :  { %894 = vrot.lane.b32.xlu1 %v339_v29, %s4177_s2  ;;  %886 = vrot.lane.b32.xlu0 %v339_v29, %s4178_s27  ;;  %v902_v54 = vshrl.u32 %v339_v29, 16 }
 0x133   :  { %v280_v30 = vpop.f32.mrb[4].mxu0 }
 0x134   :  { %v282_v31 = vpop.f32.mrb[5].mxu0 }
 0x135   :  { %346 = vrot.lane.b32.xlu1 %v4253_v27, %s4178_s27  ;;  %890 = vrot.lane.b32.xlu0 %v339_v29, %s4173_s1  ;;  %v284_v33 = vpop.f32.mrb[6].mxu0 }
 0x136   :  { %v4260_v34 = vpack.c.bf16 %v284_v33, %v280_v30  ;;  %v286_v35 = vpop.f32.mrb[7].mxu0 }
 0x137   :  { %v4262_v36 = vpack.c.bf16 %v286_v35, %v282_v31 }
 0x139   :  { %354 = vrot.lane.b32.xlu1 %v4253_v27, %s4177_s2  ;;  %350 = vrot.lane.b32.xlu0 %v4253_v27, %s4173_s1 }
 0x13d   :  { %892 = vrot.lane.b32.xlu1 %v4262_v36, %s4173_s1  ;;  %888 = vrot.lane.b32.xlu0 %v4262_v36, %s4178_s27 }
 0x141   :  { %348 = vrot.lane.b32.xlu1 %v4260_v34, %s4178_s27  ;;  %896 = vrot.lane.b32.xlu0 %v4262_v36, %s4177_s2 }
 0x145   :  { %356 = vrot.lane.b32.xlu1 %v4260_v34, %s4177_s2  ;;  %352 = vrot.lane.b32.xlu0 %v4260_v34, %s4173_s1 }
 0x1a3   :  { %v895_v43 = vpop.permute.xlu1 %894  ;;  %v887_v44 = vpop.permute.xlu0 %886 }
 0x1a4   :  { %v900_v50 = vpack.i.b16 %v887_v44, %v339_v29  ;;  %v903_v51 = vshrl.u32 %v887_v44, 16  ;;  %v911_v58 = vshrl.u32 %v895_v43, 16 }
 0x1a6   :  { %v904_v62 = vpack.i.b16 %v903_v51, %v902_v54  ;;  %v930_v63 = vcombine.high %v900_v50, %v4291_v49  ;;  %v937_v8 = vrot.slane %v900_v50, %v4294_v59 }
 0x1a7   :  { %v347_v52 = vpop.permute.xlu1 %346  ;;  %v891_v53 = vpop.permute.xlu0 %890 }
 0x1a8   :  { %v363_v55 = vshrl.u32 %v347_v52, 16  ;;  %v908_v56 = vpack.i.b16 %v895_v43, %v891_v53  ;;  %v910_v57 = vshrl.u32 %v891_v53, 16  ;;  %v360_v0 = vpack.i.b16 %v347_v52, %v4253_v27 }
 0x1a9   :  { %v944_v12 = vrot.slane %v930_v63, %v4294_v59  ;;  %v996_v13 = vcombine.high %v904_v62, %v4291_v49  ;;  %v1003_v23 = vrot.slane %v904_v62, %v4294_v59 }
 0x1aa   :  { %v945_v1 = vcombine.high %v908_v56, %v4291_v49  ;;  %v364_v4 = vpack.i.b16 %v363_v55, %v362_v60  ;;  %v912_v5 = vpack.i.b16 %v911_v58, %v910_v57  ;;  %v952_v6 = vrot.slane %v908_v56, %v4294_v59 }
 0x1ab   :  { %v355_v2 = vpop.permute.xlu1 %354  ;;  %v351_v3 = vpop.permute.xlu0 %350  ;;  %v396_v14 = vcombine.high %v360_v0, %v4291_v49  ;;  %v1010_v27 = vrot.slane %v996_v13, %v4294_v59  ;;  %v403_v28 = vrot.slane %v360_v0, %v4294_v59 }
 0x1ac   :  { %v368_v7 = vpack.i.b16 %v355_v2, %v351_v3  ;;  %v959_v9 = vrot.slane %v945_v1, %v4294_v59  ;;  %v371_v10 = vshrl.u32 %v355_v2, 16  ;;  %v370_v11 = vshrl.u32 %v351_v3, 16 }
 0x1ad   :  { %v462_v16 = vcombine.high %v364_v4, %v4291_v49  ;;  %v960_v17 = vcombine.low %v937_v8, %v952_v6  ;;  %v961_v18 = vcombine.high %v937_v8, %v952_v6  ;;  %v1011_v19 = vcombine.high %v912_v5, %v4291_v49 }
 0x1ae   :  { %v1018_v20 = vrot.slane %v912_v5, %v4294_v59  ;;  %v411_v21 = vcombine.high %v368_v7, %v4291_v49  ;;  %v418_v22 = vrot.slane %v368_v7, %v4294_v59  ;;  %v976_v24 = vcombine.low %v944_v12, %v959_v9 }
 0x1af   :  { %v977_v25 = vcombine.high %v944_v12, %v959_v9  ;;  %v372_v26 = vpack.i.b16 %v371_v10, %v370_v11  ;;  %v410_v29 = vrot.slane %v396_v14, %v4294_v59  ;;  %v469_v30 = vrot.slane %v364_v4, %v4294_v59  ;;  %v4333_v53 = vpop.permute.xlu1 %892  ;;  %v4335_v54 = vpop.permute.xlu0 %888 }
 0x1b0   :  { %v476_v31 = vrot.slane %v462_v16, %v4294_v59  ;;  %v968_v32 = vrot.slane %v960_v17, %v4307_v15  ;;  %v975_v33 = vrot.slane %v961_v18, %v4307_v15  ;;  %v1025_v35 = vrot.slane %v1011_v19, %v4294_v59 }
 0x1b1   :  { %v1026_v37 = vcombine.low %v1003_v23, %v1018_v20  ;;  %v1027_v38 = vcombine.high %v1003_v23, %v1018_v20  ;;  %v425_v40 = vrot.slane %v411_v21, %v4294_v59  ;;  %v426_v41 = vcombine.low %v403_v28, %v418_v22 }
 0x1b2   :  { %v4325_v43 = vrot.slane %v976_v24, %v4307_v15  ;;  %v4328_v44 = vrot.slane %v977_v25, %v4307_v15  ;;  %v427_v45 = vcombine.high %v403_v28, %v418_v22  ;;  %v477_v47 = vcombine.high %v372_v26, %v4291_v49 }
 0x1b3   :  { %v434_v48 = vrot.slane %v426_v41, %v4307_v15  ;;  %v442_v50 = vcombine.low %v410_v29, %v425_v40  ;;  %v443_v51 = vcombine.high %v410_v29, %v425_v40  ;;  %v484_v52 = vrot.slane %v372_v26, %v4294_v59  ;;  %v349_v17 = vpop.permute.xlu1 %348  ;;  %v897_v18 = vpop.permute.xlu0 %896 }
 0x1b4   :  { %v1042_v55 = vcombine.low %v1010_v27, %v1025_v35  ;;  %v1043_v56 = vcombine.high %v1010_v27, %v1025_v35  ;;  %v441_v57 = vrot.slane %v427_v45, %v4307_v15  ;;  %v491_v58 = vrot.slane %v477_v47, %v4294_v59 }
 0x1b5   :  { %v450_v60 = vrot.slane %v442_v50, %v4307_v15  ;;  %v457_v61 = vrot.slane %v443_v51, %v4307_v15  ;;  %v492_v62 = vcombine.low %v469_v30, %v484_v52  ;;  %v493_v63 = vcombine.high %v469_v30, %v484_v52 }
 0x1b6   :  { %v508_v0 = vcombine.low %v476_v31, %v491_v58  ;;  %v509_v1 = vcombine.high %v476_v31, %v491_v58  ;;  %v660_v2 = vcombine.low %v434_v48, %v441_v57  ;;  %v3677_v3 = vcombine.high %v434_v48, %v441_v57 }
 0x1b7   :  { %v500_v4 = vrot.slane %v492_v62, %v4307_v15  ;;  %v507_v5 = vrot.slane %v493_v63, %v4307_v15  ;;  %v676_v6 = vcombine.low %v450_v60, %v457_v61  ;;  %v3678_v7 = vcombine.high %v450_v60, %v457_v61  ;;  %v357_v50 = vpop.permute.xlu1 %356  ;;  %v353_v51 = vpop.permute.xlu0 %352 }
 0x1b8   :  { %v516_v8 = vrot.slane %v508_v0, %v4307_v15  ;;  %v523_v9 = vrot.slane %v509_v1, %v4307_v15  ;;  %v918_v10 = vshrl.u32 %v4262_v36, 16  ;;  %v384_v11 = vshrl.u32 %v4260_v34, 16 }
 0x1b9   :  { %v4348_v12 = vrot.slane %v1026_v37, %v4307_v15  ;;  %v4351_v13 = vrot.slane %v1027_v38, %v4307_v15  ;;  %v1194_v14 = vcombine.low %v968_v32, %v975_v33  ;;  %v3685_v16 = vcombine.high %v968_v32, %v975_v33 }
 0x1ba   :  { %v4354_v19 = vrot.slane %v1042_v55, %v4307_v15  ;;  %v4357_v20 = vrot.slane %v1043_v56, %v4307_v15  ;;  %v667_v21 = vrot.slane %v660_v2, %v4294_v59  ;;  %v675_v22 = vrot.slane %v3677_v3, %v4294_v59 }
 0x1bb   :  { %v1210_v23 = vcombine.low %v4325_v43, %v4328_v44  ;;  %v683_v24 = vrot.slane %v676_v6, %v4294_v59  ;;  %v691_v25 = vrot.slane %v3678_v7, %v4294_v59  ;;  %v710_v26 = vcombine.low %v500_v4, %v507_v5 }
 0x1bc   :  { %v3679_v27 = vcombine.high %v500_v4, %v507_v5  ;;  %v726_v28 = vcombine.low %v516_v8, %v523_v9  ;;  %v3680_v29 = vcombine.high %v516_v8, %v523_v9  ;;  %v916_v30 = vpack.i.b16 %v4335_v54, %v4262_v36 }
 0x1bd   :  { %v4368_v31 = vrot.slane %v1194_v14, %v4294_v59  ;;  %v3686_v32 = vcombine.high %v4325_v43, %v4328_v44  ;;  %v1244_v33 = vcombine.low %v4348_v12, %v4351_v13  ;;  %v3687_v35 = vcombine.high %v4348_v12, %v4351_v13 }
 0x1be   :  { %v4377_v37 = vrot.slane %v3685_v16, %v4294_v59  ;;  %v1260_v38 = vcombine.low %v4354_v19, %v4357_v20  ;;  %v692_v40 = vcombine.low %v667_v21, %v675_v22  ;;  %v919_v36 = vshrl.u32 %v4335_v54, 16 }
 0x1bf   :  { %v700_v41 = vcombine.low %v683_v24, %v691_v25  ;;  %v717_v45 = vrot.slane %v710_v26, %v4294_v59  ;;  %v926_v47 = vshrl.u32 %v4333_v53, 16  ;;  %v924_v48 = vpack.i.b16 %v897_v18, %v4333_v53 }
 0x1c0   :  { %v725_v52 = vrot.slane %v3679_v27, %v4294_v59  ;;  %v733_v55 = vrot.slane %v726_v28, %v4294_v59  ;;  %v741_v56 = vrot.slane %v3680_v29, %v4294_v59  ;;  %v1062_v57 = vcombine.high %v916_v30, %v4291_v49 }
 0x1c1   :  { %v385_v58 = vshrl.u32 %v349_v17, 16  ;;  %v927_v60 = vshrl.u32 %v897_v18, 16  ;;  %v1077_v54 = vcombine.high %v924_v48, %v4291_v49  ;;  %v1084_v61 = vrot.slane %v924_v48, %v4294_v59 }
 0x1c2   :  { %v3688_v62 = vcombine.high %v4354_v19, %v4357_v20  ;;  %v4394_v53 = vrot.slane %v692_v40, %v4307_v15  ;;  %v920_v63 = vpack.i.b16 %v919_v36, %v918_v10  ;;  %v390_v0 = vpack.i.b16 %v357_v50, %v353_v51 }
 0x1c3   :  { %v1069_v1 = vrot.slane %v916_v30, %v4294_v59  ;;  %v382_v2 = vpack.i.b16 %v349_v17, %v4260_v34  ;;  %v928_v3 = vpack.i.b16 %v927_v60, %v926_v47  ;;  %v1091_v4 = vrot.slane %v1077_v54, %v4294_v59 }
 0x1c4   :  { %v4400_v5 = vrot.slane %v700_v41, %v4307_v15  ;;  %v742_v6 = vcombine.low %v717_v45, %v725_v52  ;;  %v750_v7 = vcombine.low %v733_v55, %v741_v56  ;;  %v1076_v8 = vrot.slane %v1062_v57, %v4294_v59 }
 0x1c5   :  { %v386_v9 = vpack.i.b16 %v385_v58, %v384_v11  ;;  %v1092_v14 = vcombine.low %v1069_v1, %v1084_v61  ;;  %v1093_v16 = vcombine.high %v1069_v1, %v1084_v61  ;;  %v543_v10 = vcombine.high %v390_v0, %v4291_v49 }
 0x1c6   :  { %v1128_v18 = vcombine.high %v920_v63, %v4291_v49  ;;  %v1143_v21 = vcombine.high %v928_v3, %v4291_v49  ;;  %v393_v34 = vshrl.u32 %v357_v50, 16  ;;  %v392_v17 = vshrl.u32 %v353_v51, 16 }
 0x1c7   :  { %v528_v22 = vcombine.high %v382_v2, %v4291_v49  ;;  %v1108_v24 = vcombine.low %v1076_v8, %v1091_v4  ;;  %v1109_v25 = vcombine.high %v1076_v8, %v1091_v4  ;;  %v1150_v26 = vrot.slane %v928_v3, %v4294_v59 }
 0x1c8   :  { %v4409_v27 = vrot.slane %v742_v6, %v4307_v15  ;;  %v4412_v11 = vrot.slane %v750_v7, %v4307_v15  ;;  %v1135_v28 = vrot.slane %v920_v63, %v4294_v59  ;;  %v550_v29 = vrot.slane %v390_v0, %v4294_v59 }
 0x1c9   :  { %v594_v30 = vcombine.high %v386_v9, %v4291_v49  ;;  %v1100_v40 = vrot.slane %v1092_v14, %v4307_v15  ;;  %v1107_v36 = vrot.slane %v1093_v16, %v4307_v15  ;;  %v557_v41 = vrot.slane %v543_v10, %v4294_v59 }
 0x1ca   :  { %v1142_v45 = vrot.slane %v1128_v18, %v4294_v59  ;;  %v535_v47 = vrot.slane %v382_v2, %v4294_v59  ;;  %v1157_v48 = vrot.slane %v1143_v21, %v4294_v59  ;;  %v394_v50 = vpack.i.b16 %v393_v34, %v392_v17 }
 0x1cb   :  { %v542_v51 = vrot.slane %v528_v22, %v4294_v59  ;;  %v4425_v52 = vrot.slane %v1108_v24, %v4307_v15  ;;  %v4428_v55 = vrot.slane %v1109_v25, %v4307_v15  ;;  %v1158_v56 = vcombine.low %v1135_v28, %v1150_v26 }
 0x1cc   :  { %v601_v57 = vrot.slane %v386_v9, %v4294_v59  ;;  %v1159_v58 = vcombine.high %v1135_v28, %v1150_v26  ;;  %v558_v60 = vcombine.low %v535_v47, %v550_v29  ;;  %v559_v54 = vcombine.high %v535_v47, %v550_v29 }
 0x1cd   :  { %v608_v61 = vrot.slane %v594_v30, %v4294_v59  ;;  %v1294_v63 = vcombine.low %v1100_v40, %v1107_v36  ;;  %v574_v0 = vcombine.low %v542_v51, %v557_v41  ;;  %v575_v1 = vcombine.high %v542_v51, %v557_v41 }
 0x1ce   :  { %v1174_v2 = vcombine.low %v1142_v45, %v1157_v48  ;;  %v3689_v3 = vcombine.high %v1100_v40, %v1107_v36  ;;  %v609_v4 = vcombine.high %v394_v50, %v4291_v49  ;;  %v616_v6 = vrot.slane %v394_v50, %v4294_v59 }
 0x1cf   :  { %v1166_v7 = vrot.slane %v1158_v56, %v4307_v15  ;;  %v1175_v8 = vcombine.high %v1142_v45, %v1157_v48  ;;  %v1310_v9 = vcombine.low %v4425_v52, %v4428_v55  ;;  %v3690_v14 = vcombine.high %v4425_v52, %v4428_v55 }
 0x1d0   :  { %v1173_v16 = vrot.slane %v1159_v58, %v4307_v15  ;;  %v566_v10 = vrot.slane %v558_v60, %v4307_v15  ;;  %v573_v18 = vrot.slane %v559_v54, %v4307_v15  ;;  %v623_v21 = vrot.slane %v609_v4, %v4294_v59 }
 0x1d1   :  { %v582_v34 = vrot.slane %v574_v0, %v4307_v15  ;;  %v589_v17 = vrot.slane %v575_v1, %v4307_v15  ;;  %v1217_v22 = vrot.slane %v1210_v23, %v4294_v59  ;;  %v1225_v24 = vrot.slane %v3686_v32, %v4294_v59 }
 0x1d2   :  { %v624_v25 = vcombine.low %v601_v57, %v616_v6  ;;  %v625_v26 = vcombine.high %v601_v57, %v616_v6  ;;  %v640_v28 = vcombine.low %v608_v61, %v623_v21  ;;  %v641_v29 = vcombine.high %v608_v61, %v623_v21 }
 0x1d3   :  { %v1182_v30 = vrot.slane %v1174_v2, %v4307_v15  ;;  %v1189_v40 = vrot.slane %v1175_v8, %v4307_v15  ;;  %v1301_v36 = vrot.slane %v1294_v63, %v4294_v59  ;;  %v1309_v41 = vrot.slane %v3689_v3, %v4294_v59 }
 0x1d4   :  { %v1344_v45 = vcombine.low %v1166_v7, %v1173_v16  ;;  %v3691_v47 = vcombine.high %v1166_v7, %v1173_v16  ;;  %v760_v23 = vcombine.low %v566_v10, %v573_v18  ;;  %v3681_v48 = vcombine.high %v566_v10, %v573_v18 }
 0x1d5   :  { %v776_v50 = vcombine.low %v582_v34, %v589_v17  ;;  %v1226_v43 = vcombine.low %v4368_v31, %v4377_v37  ;;  %v1234_v44 = vcombine.low %v1217_v22, %v1225_v24  ;;  %v1251_v32 = vrot.slane %v1244_v33, %v4294_v59 }
 0x1d6   :  { %v632_v51 = vrot.slane %v624_v25, %v4307_v15  ;;  %v639_v52 = vrot.slane %v625_v26, %v4307_v15  ;;  %v648_v55 = vrot.slane %v640_v28, %v4307_v15  ;;  %v655_v56 = vrot.slane %v641_v29, %v4307_v15 }
 0x1d7   :  { %v1360_v57 = vcombine.low %v1182_v30, %v1189_v40  ;;  %v1259_v31 = vrot.slane %v3687_v35, %v4294_v59  ;;  %v1267_v33 = vrot.slane %v1260_v38, %v4294_v59  ;;  %v1275_v37 = vrot.slane %v3688_v62, %v4294_v59 }
 0x1d8   :  { %v3692_v58 = vcombine.high %v1182_v30, %v1189_v40  ;;  %v4480_v60 = vrot.slane %v760_v23, %v4294_v59  ;;  %v4483_v54 = vrot.slane %v3681_v48, %v4294_v59  ;;  %v1241_v12 = vrot.slane %v1234_v44, %v4307_v15 }
 0x1d9   :  { %v4487_v13 = vrot.slane %v776_v50, %v4294_v59  ;;  %v3682_v35 = vcombine.high %v582_v34, %v589_v17  ;;  %v1276_v61 = vcombine.low %v1251_v32, %v1259_v31  ;;  %v1284_v38 = vcombine.low %v1267_v33, %v1275_v37 }
 0x1da   :  { %v810_v63 = vcombine.low %v632_v51, %v639_v52  ;;  %v3683_v0 = vcombine.high %v632_v51, %v639_v52  ;;  %v826_v1 = vcombine.low %v648_v55, %v655_v56  ;;  %v1233_v19 = vrot.slane %v1226_v43, %v4307_v15 }
 0x1db   :  { %v3684_v20 = vcombine.high %v648_v55, %v655_v56  ;;  %v1283_v62 = vrot.slane %v1276_v61, %v4307_v15  ;;  %v1291_v2 = vrot.slane %v1284_v38, %v4307_v15  ;;  %v1317_v3 = vrot.slane %v1310_v9, %v4294_v59 }
 0x1dc   :  { %v1242_v4 = vcombine.low %v1233_v19, %v1241_v12  ;;  %v4493_v6 = vcombine.high %v1233_v19, %v1241_v12  ;;  %v1325_v7 = vrot.slane %v3690_v14, %v4294_v59  ;;  %v1351_v8 = vrot.slane %v1344_v45, %v4294_v59 }
 0x1dd   :  { %v1292_v16 = vcombine.low %v1283_v62, %v1291_v2  ;;  %v4497_v10 = vcombine.high %v1283_v62, %v1291_v2  ;;  %v1359_v18 = vrot.slane %v3691_v47, %v4294_v59  ;;  %v1367_v21 = vrot.slane %v1360_v57, %v4294_v59 }
 0x1de   :  { %v833_v34 = vrot.slane %v826_v1, %v4294_v59  ;;  %v1326_v17 = vcombine.low %v1301_v36, %v1309_v41  ;;  %v1334_v22 = vcombine.low %v1317_v3, %v1325_v7  ;;  %v1375_v9 = vrot.slane %v3692_v58, %v4294_v59 }
 0x1df   :  { %v841_v24 = vrot.slane %v3684_v20, %v4294_v59  ;;  %v1396_v25 = vpack.i.b16 %v1292_v16, %v1242_v4  ;;  %v1402_v14 = vpack.i.b16 %v4497_v10, %v4493_v6  ;;  %v1376_v26 = vcombine.low %v1351_v8, %v1359_v18 }
 0x1e0   :  { %v791_v28 = vrot.slane %v3682_v35, %v4294_v59  ;;  %v817_v29 = vrot.slane %v810_v63, %v4294_v59  ;;  %v1341_v30 = vrot.slane %v1334_v22, %v4307_v15  ;;  %v1384_v40 = vcombine.low %v1367_v21, %v1375_v9 }
 0x1e1   :  { %v825_v45 = vrot.slane %v3683_v0, %v4294_v59  ;;  %v1965_v36 = vsel %vm1960_vm1, %v1396_v25, 0  ;;  %v2059_v41 = vsel %vm1960_vm1, %v1402_v14, 0  ;;  %v1398_v47 = vshrl.u32 %v1292_v16, 16 }
 0x1e2   :  { %3807 = vmatpush3.bf16.xpose.msra.mxu0 %v1965_v36  ;;  %3819 = vmatpush3.bf16.xpose.msra.mxu1 %v2059_v41  ;;  %v1333_v23 = vrot.slane %v1326_v17, %v4307_v15  ;;  %v1383_v48 = vrot.slane %v1376_v26, %v4307_v15  ;;  %v1391_v50 = vrot.slane %v1384_v40, %v4307_v15  ;;  %v1397_v51 = vshrl.u32 %v1242_v4, 16 }
 0x1e3   :  { %v850_v43 = vcombine.low %v833_v34, %v841_v24  ;;  %v758_v44 = vcombine.low %v4409_v27, %v4412_v11  ;;  %3812 = vmatprep.subr.bf16.mxu0 %v4179_v39  ;;  %v759_v32 = vcombine.high %v4409_v27, %v4412_v11  ;;  %3830 = vmatprep.subr.bf16.mxu1 %v4179_v39  ;;  %v1404_v38 = vshrl.u32 %v4497_v10, 16 }
 0x1e4   :  { %v708_v52 = vcombine.low %v4394_v53, %v4400_v5  ;;  %v1342_v55 = vcombine.low %v1333_v23, %v1341_v30  ;;  %v1392_v56 = vcombine.low %v1383_v48, %v1391_v50  ;;  %v800_v57 = vcombine.low %v4487_v13, %v791_v28 }
 0x1e5   :  { %v842_v31 = vcombine.low %v817_v29, %v825_v45  ;;  %v709_v33 = vcombine.high %v4394_v53, %v4400_v5  ;;  %v1399_v37 = vpack.i.b16 %v1398_v47, %v1397_v51  ;;  %v792_v58 = vcombine.low %v4480_v60, %v4483_v54 }
 0x1e6   :  { %v1408_v12 = vpack.i.b16 %v1392_v56, %v1342_v55  ;;  %v862_v27 = vpack.i.b16 %v758_v44, %v708_v52  ;;  %v857_v35 = vrot.slane %v850_v43, %v4307_v15  ;;  %v807_v53 = vrot.slane %v800_v57, %v4307_v15 }
 0x1e7   :  { %v868_v11 = vpack.i.b16 %v759_v32, %v709_v33  ;;  %v2012_v13 = vsel %vm1960_vm1, %v1399_v37, 0  ;;  %v849_v5 = vrot.slane %v842_v31, %v4307_v15  ;;  %v1393_v60 = vcombine.high %v1383_v48, %v1391_v50 }
 0x1e8   :  { %v2153_v61 = vsel %vm1960_vm1, %v1408_v12, 0  ;;  %v799_v54 = vrot.slane %v792_v58, %v4307_v15  ;;  %v864_v63 = vshrl.u32 %v758_v44, 16  ;;  %v1403_v0 = vshrl.u32 %v4493_v6, 16 }
 0x1e9   :  { %3809 = vmatmul.mubr.msk.bf16.vlgmr.msra.gmra.mrb[8].mxu0 %vm1960_vm1, %v862_v27  ;;  %3821 = vmatmul.mubr.msk.bf16.vlgmr.msra.gmra.mrb[4].mxu1 %vm1960_vm1, %v868_v11  ;;  %v858_v1 = vcombine.low %v849_v5, %v857_v35  ;;  %v1343_v19 = vcombine.high %v1333_v23, %v1341_v30  ;;  %v863_v20 = vshrl.u32 %v708_v52, 16  ;;  %v1410_v16 = vshrl.u32 %v1392_v56, 16  ;;  %v3804_v23 = vpop.f32.mrb[0].mxu1 }
 0x1ea   :  { %3813 = vmatpush3.bf16.xpose.msra.mxu0 %v2012_v13  ;;  %3831 = vmatpush3.bf16.xpose.msra.mxu1 %v2153_v61  ;;  %v1405_v62 = vpack.i.b16 %v1404_v38, %v1403_v0  ;;  %v808_v2 = vcombine.low %v799_v54, %v807_v53  ;;  %v870_v10 = vshrl.u32 %v759_v32, 16  ;;  %v1409_v18 = vshrl.u32 %v1342_v55, 16  ;;  %v323_v48 = vpop.f32.mrb[1].mxu1 }
 0x1eb   :  { %3814 = vmatprep.mubr.msk.bf16.mxu0 %vm4180_vm0, %v4179_v39  ;;  %3824 = vmatprep.subr.bf16.mxu0 %v4179_v39  ;;  %v1414_v3 = vpack.i.b16 %v1393_v60, %v1343_v19  ;;  %v865_v4 = vpack.i.b16 %v864_v63, %v863_v20  ;;  %v859_v21 = vcombine.high %v849_v5, %v857_v35  ;;  %v869_v34 = vshrl.u32 %v709_v33, 16  ;;  %v3805_v50 = vpop.f32.mrb[2].mxu1 }
 0x1ec   :  { %3832 = vmatprep.mubr.msk.bf16.mxu1 %vm4180_vm0, %v4179_v39  ;;  %3842 = vmatprep.subr.bf16.mxu1 %v4179_v39  ;;  %v874_v7 = vpack.i.b16 %v858_v1, %v808_v2  ;;  %v2106_v8 = vsel %vm1960_vm1, %v1405_v62, 0  ;;  %v1411_v17 = vpack.i.b16 %v1410_v16, %v1409_v18  ;;  %v809_v22 = vcombine.high %v799_v54, %v807_v53  ;;  %v326_v44 = vpop.f32.mrb[3].mxu1 }
 0x1ed   :  { %v2247_v6 = vsel %vm1960_vm1, %v1414_v3, 0  ;;  %v871_v9 = vpack.i.b16 %v870_v10, %v869_v34  ;;  %v1416_v14 = vshrl.u32 %v1393_v60, 16  ;;  %v876_v26 = vshrl.u32 %v858_v1, 16 }
 0x1ee   :  { %v880_v24 = vpack.i.b16 %v859_v21, %v809_v22  ;;  %v2200_v25 = vsel %vm1960_vm1, %v1411_v17, 0  ;;  %v1415_v28 = vshrl.u32 %v1343_v19, 16  ;;  %v875_v29 = vshrl.u32 %v808_v2, 16 }
 0x1ef   :  { %v882_v36 = vshrl.u32 %v859_v21, 16  ;;  %v881_v41 = vshrl.u32 %v809_v22, 16  ;;  %v4570_v43 = vpack.c.bf16 %v3805_v50, %v3804_v23  ;;  %v4572_v32 = vpack.c.bf16 %v326_v44, %v323_v48 }
 0x1f0   :  { %v1417_v30 = vpack.i.b16 %v1416_v14, %v1415_v28  ;;  %v877_v40 = vpack.i.b16 %v876_v26, %v875_v29  ;;  %v2341_v51 = vand.u32 127, %v400_v42  ;;  %v2339_v52 = vadd.s32 8, %v4287_v46 }
 0x1f1   :  { %3815 = vmatmul.mubr.msk.bf16.vlgmr.msra.gmra.mrb[12].mxu0 %vm1960_vm1, %v865_v4  ;;  %3833 = vmatmul.mubr.msk.bf16.vlgmr.msra.gmra.mrb[8].mxu1 %vm1960_vm1, %v874_v7  ;;  %v883_v47 = vpack.i.b16 %v882_v36, %v881_v41 }
 0x1f2   :  { %3825 = vmatpush3.bf16.xpose.msra.mxu0 %v2106_v8  ;;  %3843 = vmatpush3.bf16.xpose.msra.mxu1 %v2247_v6  ;;  %v2294_v45 = vsel %vm1960_vm1, %v1417_v30, 0  ;;  %vm4577_vm2 = vcmp.le.s32.totalorder %v2341_v51, %v4287_v46  ;;  %vm4581_vm4 = vcmp.le.s32.totalorder %v2341_v51, %v2339_v52 }
 0x1f3   :  { %3826 = vmatprep.mubr.msk.bf16.mxu0 %vm4180_vm0, %v4179_v39  ;;  %3836 = vmatprep.subr.bf16.mxu0 %v4179_v39 }
 0x1f4   :  { %3844 = vmatprep.mubr.msk.bf16.mxu1 %vm4180_vm0, %v4179_v39  ;;  %3854 = vmatprep.subr.bf16.mxu1 %v4179_v39 }
 0x1f9   :  { %3827 = vmatmul.mubr.msk.bf16.vlgmr.msra.gmra.mrb[16].mxu0 %vm1960_vm1, %v871_v9  ;;  %3845 = vmatmul.mubr.msk.bf16.vlgmr.msra.gmra.mrb[12].mxu1 %vm1960_vm1, %v880_v24 }
 0x1fa   :  { %3837 = vmatpush3.bf16.xpose.msra.mxu0 %v2200_v25  ;;  %3838 = vmatprep.mubr.msk.bf16.mxu0 %vm4180_vm0, %v4179_v39 }
 0x1fb   :  { %3848 = vmatprep.subr.bf16.mxu0 %v4179_v39  ;;  %3856 = vmatprep.mubr.msk.bf16.mxu1 %vm4180_vm0, %v4179_v39 }
 0x201   :  { %3839 = vmatmul.mubr.msk.bf16.vlgmr.msra.gmra.mrb[20].mxu0 %vm1960_vm1, %v877_v40 }
 0x202   :  { %3849 = vmatpush3.bf16.xpose.msra.mxu0 %v2294_v45  ;;  %3850 = vmatprep.mubr.msk.bf16.mxu0 %vm4180_vm0, %v4179_v39 }
 0x203   :  { %3860 = vmatprep.subr.bf16.mxu0 %v4179_v39 }
 0x209   :  { %3851 = vmatmul.mubr.msk.bf16.vlgmr.msra.gmra.mrb[24].mxu0 %vm1960_vm1, %v883_v47 }
 0x20a   :  { %3862 = vmatprep.mubr.msk.bf16.mxu0 %vm4180_vm0, %v4179_v39 }
 0x2bc   :  { %v2001_v56 = vpop.f32.mrb[8].mxu0  ;;  %v2095_v57 = vpop.f32.mrb[4].mxu1 }
 0x2bd   :  { %v4587_v33 = vsel %vm4577_vm2, %v2001_v56, -1.7014117e+38  ;;  %v4591_v42 = vsel %vm4577_vm2, %v2095_v57, -1.7014117e+38  ;;  %v3810_v37 = vpop.f32.mrb[9].mxu0  ;;  %v3822_v46 = vpop.f32.mrb[5].mxu1 }
 0x2be   :  { %v2004_v58 = vpop.f32.mrb[10].mxu0  ;;  %v2098_v12 = vpop.f32.mrb[6].mxu1  ;;  %v2377_v27 = vsel %vm2364_vm3, %v4591_v42, -inf  ;;  %v2365_v11 = vsel %vm2364_vm3, %v4587_v33, -inf }
 0x2bf   :  { %v4599_v35 = vsel %vm4581_vm4, %v2004_v58, -1.7014117e+38  ;;  %v3811_v61 = vpop.f32.mrb[11].mxu0  ;;  %v3823_v38 = vpop.f32.mrb[7].mxu1  ;;  %2378 = vmax.xlane.f32.xlu1 %v2377_v27  ;;  %2366 = vmax.xlane.f32.xlu0 %v2365_v11  ;;  %v4623_v8 = vsel %vm4581_vm4, %v2098_v12, -1.7014117e+38 }
 0x2c0   :  { %v2368_v13 = vsel %vm2364_vm3, %v4599_v35, -inf  ;;  %v2380_v22 = vsel %vm2364_vm3, %v4623_v8, -inf }
 0x2c3   :  { %2369 = vmax.xlane.f32.xlu1 %v2368_v13 }
 0x2c4   :  { %v2048_v53 = vpop.f32.mrb[12].mxu0  ;;  %v2189_v5 = vpop.f32.mrb[8].mxu1 }
 0x2c5   :  { %v4605_v60 = vsel %vm4577_vm2, %v2048_v53, -1.7014117e+38  ;;  %v3816_v54 = vpop.f32.mrb[13].mxu0  ;;  %v4609_v63 = vsel %vm4577_vm2, %v2189_v5, -1.7014117e+38  ;;  %v3834_v0 = vpop.f32.mrb[9].mxu1 }
 0x2c6   :  { %v2051_v1 = vpop.f32.mrb[14].mxu0  ;;  %v2371_v19 = vsel %vm2364_vm3, %v4605_v60, -inf  ;;  %v2192_v20 = vpop.f32.mrb[10].mxu1  ;;  %v2389_v62 = vsel %vm2364_vm3, %v4609_v63, -inf }
 0x2c7   :  { %v4617_v2 = vsel %vm4581_vm4, %v2051_v1, -1.7014117e+38  ;;  %v3817_v3 = vpop.f32.mrb[15].mxu0  ;;  %2372 = vmax.xlane.f32.xlu0 %v2371_v19  ;;  %2390 = vmax.xlane.f32.xlu1 %v2389_v62  ;;  %v3835_v4 = vpop.f32.mrb[11].mxu1  ;;  %v4647_v30 = vsel %vm4581_vm4, %v2192_v20, -1.7014117e+38 }
 0x2c8   :  { %v2374_v7 = vsel %vm2364_vm3, %v4617_v2, -inf  ;;  %v2392_v47 = vsel %vm2364_vm3, %v4647_v30, -inf }
 0x2cb   :  { %2375 = vmax.xlane.f32.xlu0 %v2374_v7 }
 0x2cc   :  { %v2142_v6 = vpop.f32.mrb[16].mxu0  ;;  %v2283_v16 = vpop.f32.mrb[12].mxu1 }
 0x2cd   :  { %v4627_v10 = vsel %vm4577_vm2, %v2142_v6, -1.7014117e+38  ;;  %v3828_v18 = vpop.f32.mrb[17].mxu0  ;;  %v4631_v21 = vsel %vm4577_vm2, %v2283_v16, -1.7014117e+38  ;;  %v3846_v34 = vpop.f32.mrb[13].mxu1 }
 0x2ce   :  { %v2145_v17 = vpop.f32.mrb[18].mxu0  ;;  %v2383_v9 = vsel %vm2364_vm3, %v4627_v10, -inf  ;;  %v2286_v24 = vpop.f32.mrb[14].mxu1  ;;  %v2401_v28 = vsel %vm2364_vm3, %v4631_v21, -inf }
 0x2cf   :  { %v4639_v25 = vsel %vm4581_vm4, %v2145_v17, -1.7014117e+38  ;;  %v3829_v14 = vpop.f32.mrb[19].mxu0  ;;  %2381 = vmax.xlane.f32.xlu0 %v2380_v22  ;;  %2384 = vmax.xlane.f32.xlu1 %v2383_v9  ;;  %v3847_v26 = vpop.f32.mrb[15].mxu1  ;;  %v4665_v51 = vsel %vm4581_vm4, %v2286_v24, -1.7014117e+38 }
 0x2d0   :  { %v2386_v29 = vsel %vm2364_vm3, %v4639_v25, -inf  ;;  %v2404_v46 = vsel %vm2364_vm3, %v4665_v51, -inf }
 0x2d3   :  { %2387 = vmax.xlane.f32.xlu0 %v2386_v29  ;;  %2402 = vmax.xlane.f32.xlu1 %v2401_v28 }
 0x2d4   :  { %v2236_v40 = vpop.f32.mrb[20].mxu0 }
 0x2d5   :  { %v4651_v45 = vsel %vm4577_vm2, %v2236_v40, -1.7014117e+38  ;;  %v3840_v36 = vpop.f32.mrb[21].mxu0 }
 0x2d6   :  { %v2239_v41 = vpop.f32.mrb[22].mxu0  ;;  %v2395_v23 = vsel %vm2364_vm3, %v4651_v45, -inf }
 0x2d7   :  { %v4659_v48 = vsel %vm4581_vm4, %v2239_v41, -1.7014117e+38  ;;  %v3841_v50 = vpop.f32.mrb[23].mxu0  ;;  %2393 = vmax.xlane.f32.xlu0 %v2392_v47  ;;  %2396 = vmax.xlane.f32.xlu1 %v2395_v23 }
 0x2d8   :  { %v2398_v44 = vsel %vm2364_vm3, %v4659_v48, -inf }
 0x2db   :  { %2399 = vmax.xlane.f32.xlu0 %v2398_v44 }
 0x2dc   :  { %v2330_v52 = vpop.f32.mrb[24].mxu0 }
 0x2dd   :  { %v4669_v56 = vsel %vm4577_vm2, %v2330_v52, -1.7014117e+38  ;;  %v3852_v57 = vpop.f32.mrb[25].mxu0 }
 0x2de   :  { %v2333_v37 = vpop.f32.mrb[26].mxu0  ;;  %v2407_v55 = vsel %vm2364_vm3, %v4669_v56, -inf }
 0x2df   :  { %v4675_v58 = vsel %vm4581_vm4, %v2333_v37, -1.7014117e+38  ;;  %v3853_v12 = vpop.f32.mrb[27].mxu0  ;;  %2405 = vmax.xlane.f32.xlu0 %v2404_v46 }
 0x2e0   :  { %v2410_v27 = vsel %vm2364_vm3, %v4675_v58, -inf }
 0x2e3   :  { %2411 = vmax.xlane.f32.xlu0 %v2410_v27 }
 0x2e8   :  { %1420 = vrot.lane.b32.xlu1 %v4572_v32, %s4178_s27 }
 0x2f9   :  { %1424 = vrot.lane.b32.xlu0 %v4572_v32, %s4173_s1 }
 0x2fd   :  { %1422 = vrot.lane.b32.xlu0 %v4570_v43, %s4178_s27 }
 0x30c   :  { %2408 = vmax.xlane.f32.xlu1 %v2407_v55 }
 0x31d   :  { %1428 = vrot.lane.b32.xlu1 %v4572_v32, %s4177_s2 }
 0x321   :  { %1426 = vrot.lane.b32.xlu1 %v4570_v43, %s4173_s1 }
 0x34c   :  { %v2379_v31 = vpop.xlane.xlu1 %2378  ;;  %v2367_v11 = vpop.xlane.xlu0 %2366 }
 0x34d   :  { %v2417_v61 = vsub.f32 %v4591_v42, %v2379_v31  ;;  %v2413_v38 = vsub.f32 %v4587_v33, %v2367_v11 }
 0x34f   :  { %v2437_v13 = vmul.f32 1.442695, %v2417_v61  ;;  %v2429_v53 = vmul.f32 1.442695, %v2413_v38 }
 0x350   :  { %v2370_v5 = vpop.xlane.xlu1 %2369 }
 0x351   :  { %4011 = vpow2.f32 %v2437_v13  ;;  %v2414_v54 = vsub.f32 %v4599_v35, %v2370_v5 }
 0x352   :  { %4013 = vpow2.f32 %v2429_v53 }
 0x353   :  { %v2431_v0 = vmul.f32 1.442695, %v2414_v54 }
 0x354   :  { %v2373_v1 = vpop.xlane.xlu0 %2372  ;;  %v2391_v20 = vpop.xlane.xlu1 %2390 }
 0x355   :  { %4015 = vpow2.f32 %v2431_v0  ;;  %v2415_v19 = vsub.f32 %v4605_v60, %v2373_v1  ;;  %v2421_v16 = vsub.f32 %v4609_v63, %v2391_v20 }
 0x357   :  { %v2433_v62 = vmul.f32 1.442695, %v2415_v19  ;;  %v2445_v26 = vmul.f32 1.442695, %v2421_v16 }
 0x358   :  { %v2376_v3 = vpop.xlane.xlu0 %2375 }
 0x359   :  { %4017 = vpow2.f32 %v2433_v62  ;;  %v2416_v33 = vsub.f32 %v4617_v2, %v2376_v3 }
 0x35b   :  { %v4695_v4 = vpop.eup %4011  ;;  %v2435_v2 = vmul.f32 1.442695, %v2416_v33 }
 0x35c   :  { %v4698_v42 = vpop.eup %4013  ;;  %v2382_v7 = vpop.xlane.xlu0 %2381  ;;  %v2473_v35 = vsel %vm2364_vm3, %v4695_v4, 0.0 }
 0x35d   :  { %v2385_v6 = vpop.xlane.xlu1 %2384  ;;  %v2418_v18 = vsub.f32 %v4623_v8, %v2382_v7  ;;  %v2461_v34 = vsel %vm2364_vm3, %v4698_v42, 0.0  ;;  %2474 = vadd.xlane.f32.xlu0 %v2473_v35  ;;  %v1436_v35 = vshrl.u32 %v4572_v32, 16 }
 0x35e   :  { %v2419_v60 = vsub.f32 %v4627_v10, %v2385_v6  ;;  %2462 = vadd.xlane.f32.xlu1 %v2461_v34 }
 0x35f   :  { %v4707_v17 = vpop.eup %4015  ;;  %v2439_v22 = vmul.f32 1.442695, %v2418_v18 }
 0x360   :  { %v2441_v9 = vmul.f32 1.442695, %v2419_v60  ;;  %v2388_v24 = vpop.xlane.xlu0 %2387  ;;  %v2464_v63 = vsel %vm2364_vm3, %v4707_v17, 0.0 }
 0x361   :  { %v4709_v14 = vpop.xlane.xlu1 %2402  ;;  %4019 = vpow2.f32 %v2439_v22  ;;  %v2420_v8 = vsub.f32 %v4639_v25, %v2388_v24  ;;  %2465 = vadd.xlane.f32.xlu0 %v2464_v63 }
 0x362   :  { %4021 = vpow2.f32 %v2441_v9  ;;  %v2425_v7 = vsub.f32 %v4631_v21, %v4709_v14 }
 0x363   :  { %v4714_v10 = vpop.eup %4017  ;;  %4023 = vpow2.f32 %v2435_v2  ;;  %v2443_v28 = vmul.f32 1.442695, %v2420_v8 }
 0x364   :  { %v2394_v29 = vpop.xlane.xlu0 %2393  ;;  %v2467_v36 = vsel %vm2364_vm3, %v4714_v10, 0.0  ;;  %4025 = vpow2.f32 %v2445_v26  ;;  %v2453_v60 = vmul.f32 1.442695, %v2425_v7 }
 0x365   :  { %v2397_v40 = vpop.xlane.xlu1 %2396  ;;  %2468 = vadd.xlane.f32.xlu0 %v2467_v36  ;;  %4027 = vpow2.f32 %v2443_v28  ;;  %v2422_v62 = vsub.f32 %v4647_v30, %v2394_v29 }
 0x366   :  { %v2423_v41 = vsub.f32 %v4651_v45, %v2397_v40 }
 0x367   :  { %v2447_v3 = vmul.f32 1.442695, %v2422_v62 }
 0x368   :  { %v2449_v47 = vmul.f32 1.442695, %v2423_v41  ;;  %v2400_v23 = vpop.xlane.xlu0 %2399 }
 0x369   :  { %v2424_v25 = vsub.f32 %v4659_v48, %v2400_v23  ;;  %v1421_v33 = vpop.permute.xlu1 %1420 }
 0x36a   :  { %4029 = vpow2.f32 %v2449_v47  ;;  %v1437_v6 = vshrl.u32 %v1421_v33, 16  ;;  %v1434_v16 = vpack.i.b16 %v1421_v33, %v4572_v32 }
 0x36b   :  { %v4720_v50 = vpop.eup %4019  ;;  %v2451_v44 = vmul.f32 1.442695, %v2424_v25 }
 0x36c   :  { %v4722_v52 = vpop.eup %4021  ;;  %v2406_v57 = vpop.xlane.xlu0 %2405  ;;  %v2476_v37 = vsel %vm2364_vm3, %v4720_v50, 0.0  ;;  %v1438_v34 = vpack.i.b16 %v1437_v6, %v1436_v35  ;;  %v1464_v9 = vcombine.high %v1434_v16, %v4291_v49  ;;  %v1471_v8 = vrot.slane %v1434_v16, %v4294_v59 }
 0x36d   :  { %v4726_v46 = vpop.eup %4023  ;;  %4031 = vpow2.f32 %v2451_v44  ;;  %2477 = vadd.xlane.f32.xlu1 %v2476_v37  ;;  %v2426_v45 = vsub.f32 %v4665_v51, %v2406_v57  ;;  %v2479_v12 = vsel %vm2364_vm3, %v4722_v52, 0.0 }
 0x36e   :  { %v4731_v48 = vpop.eup %4025  ;;  %2480 = vadd.xlane.f32.xlu0 %v2479_v12  ;;  %v2470_v31 = vsel %vm2364_vm3, %v4726_v46, 0.0  ;;  %v1530_v21 = vcombine.high %v1438_v34, %v4291_v49  ;;  %v1478_v40 = vrot.slane %v1464_v9, %v4294_v59  ;;  %v1537_v25 = vrot.slane %v1438_v34, %v4294_v59 }
 0x36f   :  { %v2455_v27 = vmul.f32 1.442695, %v2426_v45  ;;  %v4735_v11 = vpop.eup %4027  ;;  %v2485_v51 = vsel %vm2364_vm3, %v4731_v48, 0.0 }
 0x370   :  { %v2412_v55 = vpop.xlane.xlu0 %2411  ;;  %v2482_v53 = vsel %vm2364_vm3, %v4735_v11, 0.0  ;;  %v1544_v44 = vrot.slane %v1530_v21, %v4294_v59 }
 0x371   :  { %v2428_v61 = vsub.f32 %v4675_v58, %v2412_v55  ;;  %2471 = vadd.xlane.f32.xlu1 %v2470_v31  ;;  %4033 = vpow2.f32 %v2455_v27 }
 0x372   :  { %2486 = vadd.xlane.f32.xlu0 %v2485_v51 }
 0x373   :  { %v2459_v38 = vmul.f32 1.442695, %v2428_v61 }
 0x374   :  { %v4740_v13 = vpop.eup %4029  ;;  %v1425_v2 = vpop.permute.xlu0 %1424 }
 0x375   :  { %4035 = vpow2.f32 %v2459_v38  ;;  %2483 = vadd.xlane.f32.xlu1 %v2482_v53  ;;  %v2491_v5 = vsel %vm2364_vm3, %v4740_v13, 0.0  ;;  %v1444_v24 = vshrl.u32 %v1425_v2, 16 }
 0x376   :  { %2492 = vadd.xlane.f32.xlu0 %v2491_v5  ;;  %4037 = vpow2.f32 %v2447_v3 }
 0x377   :  { %v4746_v54 = vpop.eup %4031  ;;  %4039 = vpow2.f32 %v2453_v60 }
 0x378   :  { %v2494_v58 = vsel %vm2364_vm3, %v4746_v54, 0.0 }
 0x37a   :  { %2495 = vadd.xlane.f32.xlu0 %v2494_v58 }
 0x37b   :  { %v4750_v0 = vpop.eup %4033 }
 0x37c   :  { %v2500_v1 = vsel %vm2364_vm3, %v4750_v0, 0.0 }
 0x37e   :  { %2501 = vadd.xlane.f32.xlu0 %v2500_v1 }
 0x37f   :  { %v4754_v19 = vpop.eup %4035 }
 0x380   :  { %v2506_v20 = vsel %vm2364_vm3, %v4754_v19, 0.0 }
 0x382   :  { %2507 = vadd.xlane.f32.xlu0 %v2506_v20 }
 0x386   :  { %1430 = vrot.lane.b32.xlu1 %v4570_v43, %s4177_s2 }
 0x399   :  { %v2409_v18 = vpop.xlane.xlu1 %2408 }
 0x39a   :  { %v2427_v22 = vsub.f32 %v4669_v56, %v2409_v18  ;;  %v4772_v56 = vpop.eup %4037 }
 0x39b   :  { %v2488_v51 = vsel %vm2364_vm3, %v4772_v56, 0.0  ;;  %v4790_v16 = vpop.eup %4039 }
 0x39c   :  { %v2457_v14 = vmul.f32 1.442695, %v2427_v22 }
 0x39d   :  { %v1429_v30 = vpop.permute.xlu1 %1428 }
 0x39e   :  { %v1442_v63 = vpack.i.b16 %v1429_v30, %v1425_v2  ;;  %v1445_v26 = vshrl.u32 %v1429_v30, 16  ;;  %4041 = vpow2.f32 %v2457_v14 }
 0x3a0   :  { %v1446_v28 = vpack.i.b16 %v1445_v26, %v1444_v24  ;;  %v1479_v32 = vcombine.high %v1442_v63, %v4291_v49  ;;  %v1486_v29 = vrot.slane %v1442_v63, %v4294_v59 }
 0x3a2   :  { %v1493_v36 = vrot.slane %v1479_v32, %v4294_v59  ;;  %v1494_v41 = vcombine.low %v1471_v8, %v1486_v29  ;;  %v1495_v47 = vcombine.high %v1471_v8, %v1486_v29  ;;  %v1545_v23 = vcombine.high %v1446_v28, %v4291_v49 }
 0x3a3   :  { %v1552_v57 = vrot.slane %v1446_v28, %v4294_v59  ;;  %v2497_v28 = vsel %vm2364_vm3, %v4790_v16, 0.0 }
 0x3a4   :  { %v1502_v37 = vrot.slane %v1494_v41, %v4307_v15  ;;  %v1509_v45 = vrot.slane %v1495_v47, %v4307_v15  ;;  %v1510_v12 = vcombine.low %v1478_v40, %v1493_v36  ;;  %v1511_v27 = vcombine.high %v1478_v40, %v1493_v36 }
 0x3a5   :  { %v1559_v55 = vrot.slane %v1545_v23, %v4294_v59  ;;  %v1560_v31 = vcombine.low %v1537_v25, %v1552_v57  ;;  %v1561_v61 = vcombine.high %v1537_v25, %v1552_v57 }
 0x3a6   :  { %v1518_v38 = vrot.slane %v1510_v12, %v4307_v15  ;;  %v1525_v53 = vrot.slane %v1511_v27, %v4307_v15  ;;  %v1728_v5 = vcombine.low %v1502_v37, %v1509_v45  ;;  %v3693_v58 = vcombine.high %v1502_v37, %v1509_v45 }
 0x3a7   :  { %v1568_v1 = vrot.slane %v1560_v31, %v4307_v15  ;;  %v1575_v20 = vrot.slane %v1561_v61, %v4307_v15  ;;  %v1576_v62 = vcombine.low %v1544_v44, %v1559_v55  ;;  %v1577_v3 = vcombine.high %v1544_v44, %v1559_v55 }
 0x3a8   :  { %v1735_v33 = vrot.slane %v1728_v5, %v4294_v59  ;;  %v1743_v7 = vrot.slane %v3693_v58, %v4294_v59  ;;  %v1744_v6 = vcombine.low %v1518_v38, %v1525_v53  ;;  %v3694_v35 = vcombine.high %v1518_v38, %v1525_v53  ;;  %v4798_v8 = vpop.eup %4041  ;;  %v1423_v58 = vpop.permute.xlu0 %1422 }
 0x3a9   :  { %v1584_v18 = vrot.slane %v1576_v62, %v4307_v15  ;;  %v1591_v60 = vrot.slane %v1577_v3, %v4307_v15  ;;  %v1778_v34 = vcombine.low %v1568_v1, %v1575_v20  ;;  %v3695_v2 = vcombine.high %v1568_v1, %v1575_v20  ;;  %v1427_v1 = vpop.permute.xlu1 %1426 }
 0x3aa   :  { %v1751_v22 = vrot.slane %v1744_v6, %v4294_v59  ;;  %v1759_v9 = vrot.slane %v3694_v35, %v4294_v59  ;;  %2489 = vadd.xlane.f32.xlu1 %v2488_v51  ;;  %v1760_v30 = vcombine.low %v1735_v33, %v1743_v7  ;;  %v2503_v44 = vsel %vm2364_vm3, %v4798_v8, 0.0 }
 0x3ab   :  { %v1785_v24 = vrot.slane %v1778_v34, %v4294_v59  ;;  %v1793_v63 = vrot.slane %v3695_v2, %v4294_v59  ;;  %v1794_v26 = vcombine.low %v1584_v18, %v1591_v60  ;;  %v3696_v21 = vcombine.high %v1584_v18, %v1591_v60 }
 0x3ac   :  { %v1768_v14 = vcombine.low %v1751_v22, %v1759_v9  ;;  %v1767_v36 = vrot.slane %v1760_v30, %v4307_v15  ;;  %v1453_v9 = vshrl.u32 %v1423_v58, 16 }
 0x3ad   :  { %v1801_v32 = vrot.slane %v1794_v26, %v4294_v59  ;;  %v1809_v29 = vrot.slane %v3696_v21, %v4294_v59  ;;  %v1810_v40 = vcombine.low %v1785_v24, %v1793_v63 }
 0x3ae   :  { %2498 = vadd.xlane.f32.xlu1 %v2497_v28  ;;  %v1775_v41 = vrot.slane %v1768_v14, %v4307_v15 }
 0x3af   :  { %v1818_v47 = vcombine.low %v1801_v32, %v1809_v29  ;;  %v1817_v57 = vrot.slane %v1810_v40, %v4307_v15 }
 0x3b0   :  { %v1776_v23 = vcombine.low %v1767_v36, %v1775_v41  ;;  %v1777_v25 = vcombine.high %v1767_v36, %v1775_v41  ;;  %v1460_v36 = vshrl.u32 %v1427_v1, 16 }
 0x3b1   :  { %v1825_v37 = vrot.slane %v1818_v47, %v4307_v15 }
 0x3b2   :  { %2504 = vadd.xlane.f32.xlu1 %v2503_v44  ;;  %v1932_v27 = vshrl.u32 %v1776_v23, 16  ;;  %v1940_v55 = vshrl.u32 %v1777_v25, 16 }
 0x3b3   :  { %v1826_v45 = vcombine.low %v1817_v57, %v1825_v37  ;;  %v1827_v12 = vcombine.high %v1817_v57, %v1825_v37 }
 0x3b5   :  { %v1930_v31 = vpack.i.b16 %v1826_v45, %v1776_v23  ;;  %v1933_v61 = vshrl.u32 %v1826_v45, 16  ;;  %v1938_v51 = vpack.i.b16 %v1827_v12, %v1777_v25  ;;  %v1941_v38 = vshrl.u32 %v1827_v12, 16 }
 0x3b7   :  { %3855 = vmatpush3.bf16.msra.mxu1 %v1930_v31  ;;  %v1934_v53 = vpack.i.b16 %v1933_v61, %v1932_v27  ;;  %v4810_v5 = vpack.i.b16 %v1941_v38, %v1940_v55 }
 0x3b8   :  { %3866 = vmatprep.subr.bf16.mxu1 %v4179_v39 }
 0x3b9   :  { %3861 = vmatpush3.bf16.msra.mxu0 %v1934_v53 }
 0x3ba   :  { %3872 = vmatprep.subr.bf16.mxu0 %v4179_v39 }
 0x3ea   :  { %v2475_v20 = vpop.xlane.xlu0 %2474 }
 0x3eb   :  { %v2463_v62 = vpop.xlane.xlu1 %2462 }
 0x3ec   :  { %4043 = vrcp.f32 %v2463_v62 }
 0x3ee   :  { %v2466_v3 = vpop.xlane.xlu0 %2465 }
 0x3ef   :  { %4045 = vrcp.f32 %v2466_v3 }
 0x3f0   :  { %4047 = vrcp.f32 %v2475_v20 }
 0x3f2   :  { %v2469_v18 = vpop.xlane.xlu0 %2468 }
 0x3f6   :  { %v4044_v33 = vpop.eup %4043 }
 0x3f7   :  { %v2525_v6 = vmul.f32 %v4044_v33, %v4698_v42  ;;  %v1452_v42 = vshrl.u32 %v4570_v43, 16 }
 0x3f9   :  { %v4046_v7 = vpop.eup %4045  ;;  %v1454_v63 = vpack.i.b16 %v1453_v9, %v1452_v42 }
 0x3fa   :  { %v2526_v35 = vmul.f32 %v4046_v7, %v4707_v17  ;;  %v2478_v60 = vpop.xlane.xlu1 %2477  ;;  %v1450_v17 = vpack.i.b16 %v1423_v58, %v4570_v43  ;;  %v4048_v24 = vpop.eup %4047 }
 0x3fb   :  { %4049 = vrcp.f32 %v2478_v60  ;;  %v2481_v2 = vpop.xlane.xlu0 %2480  ;;  %v2529_v28 = vmul.f32 %v4048_v24, %v4695_v4  ;;  %v1662_v43 = vcombine.high %v1454_v63, %v4291_v49  ;;  %v1669_v53 = vrot.slane %v1454_v63, %v4294_v59 }
 0x3fc   :  { %v2541_v34 = vpack.c.bf16 %v2526_v35, %v2525_v6  ;;  %4051 = vrcp.f32 %v2469_v18  ;;  %v1596_v14 = vcombine.high %v1450_v17, %v4291_v49  ;;  %v1603_v44 = vrot.slane %v1450_v17, %v4294_v59 }
 0x3fd   :  { %v1676_v58 = vrot.slane %v1662_v43, %v4294_v59 }
 0x3fe   :  { %v2472_v22 = vpop.xlane.xlu1 %2471  ;;  %3857 = vmatmul.mubr.msk.bf16.vlgmr.msra.gmra.mrb[16].mxu1 %vm2364_vm3, %v2541_v34  ;;  %v1610_v4 = vrot.slane %v1596_v14, %v4294_v59 }
 0x3ff   :  { %4053 = vrcp.f32 %v2472_v22  ;;  %3867 = vmatpush3.bf16.msra.mxu1 %v1938_v51  ;;  %3868 = vmatprep.mubr.msk.bf16.mxu1 %vm4180_vm0, %v4179_v39  ;;  %v4822_v26 = vpop.xlane.xlu0 %2486 }
 0x400   :  { %3878 = vmatprep.subr.bf16.mxu1 %v4179_v39  ;;  %4055 = vrcp.f32 %v2481_v2 }
 0x402   :  { %v2484_v30 = vpop.xlane.xlu1 %2483 }
 0x403   :  { %4057 = vrcp.f32 %v2484_v30  ;;  %v2493_v27 = vpop.xlane.xlu0 %2492 }
 0x405   :  { %v4050_v21 = vpop.eup %4049 }
 0x406   :  { %v2530_v32 = vmul.f32 %v4050_v21, %v4720_v50  ;;  %v1431_v29 = vpop.permute.xlu1 %1430  ;;  %v4052_v40 = vpop.eup %4051 }
 0x407   :  { %v1458_v41 = vpack.i.b16 %v1431_v29, %v1427_v1  ;;  %v1461_v47 = vshrl.u32 %v1431_v29, 16  ;;  %v2527_v50 = vmul.f32 %v4052_v40, %v4714_v10  ;;  %v2496_v17 = vpop.xlane.xlu0 %2495 }
 0x408   :  { %v2543_v23 = vpack.c.bf16 %v2530_v32, %v2529_v28  ;;  %4059 = vrcp.f32 %v2496_v17 }
 0x409   :  { %v4054_v25 = vpop.eup %4053  ;;  %v1462_v57 = vpack.i.b16 %v1461_v47, %v1460_v36  ;;  %v1611_v37 = vcombine.high %v1458_v41, %v4291_v49  ;;  %v1618_v45 = vrot.slane %v1458_v41, %v4294_v59  ;;  %4061 = vrcp.f32 %v2493_v27 }
 0x40a   :  { %v2528_v12 = vmul.f32 %v4054_v25, %v4726_v46  ;;  %3869 = vmatmul.mubr.msk.bf16.vlgmr.msra.gmra.mrb[20].mxu1 %vm2364_vm3, %v2543_v23  ;;  %v4056_v55 = vpop.eup %4055  ;;  %4063 = vrcp.f32 %v4822_v26 }
 0x40b   :  { %v1625_v31 = vrot.slane %v1611_v37, %v4294_v59  ;;  %v1626_v61 = vcombine.low %v1603_v44, %v1618_v45  ;;  %v1627_v51 = vcombine.high %v1603_v44, %v1618_v45  ;;  %v1677_v38 = vcombine.high %v1462_v57, %v4291_v49  ;;  %3880 = vmatprep.mubr.msk.bf16.mxu1 %vm4180_vm0, %v4179_v39 }
 0x40c   :  { %v1684_v10 = vrot.slane %v1462_v57, %v4294_v59  ;;  %v2542_v46 = vpack.c.bf16 %v2528_v12, %v2527_v50  ;;  %v2531_v7 = vmul.f32 %v4056_v55, %v4722_v52 }
 0x40d   :  { %v4058_v1 = vpop.eup %4057  ;;  %v1634_v20 = vrot.slane %v1626_v61, %v4307_v15  ;;  %v1641_v62 = vrot.slane %v1627_v51, %v4307_v15  ;;  %v1642_v3 = vcombine.low %v1610_v4, %v1625_v31  ;;  %v1643_v33 = vcombine.high %v1610_v4, %v1625_v31 }
 0x40e   :  { %v1691_v49 = vrot.slane %v1677_v38, %v4294_v59  ;;  %v1692_v6 = vcombine.low %v1669_v53, %v1684_v10  ;;  %v1693_v35 = vcombine.high %v1669_v53, %v1684_v10  ;;  %3863 = vmatmul.mubr.msk.bf16.vlgmr.msra.gmra.mrb[28].mxu0 %vm2364_vm3, %v2542_v46  ;;  %v2532_v22 = vmul.f32 %v4058_v1, %v4735_v11 }
 0x40f   :  { %v1650_v18 = vrot.slane %v1642_v3, %v4307_v15  ;;  %v1657_v60 = vrot.slane %v1643_v33, %v4307_v15  ;;  %v1828_v34 = vcombine.low %v1634_v20, %v1641_v62  ;;  %v3697_v2 = vcombine.high %v1634_v20, %v1641_v62  ;;  %3873 = vmatpush3.bf16.msra.mxu0 %v4810_v5 }
 0x410   :  { %v1700_v9 = vrot.slane %v1692_v6, %v4307_v15  ;;  %v1707_v52 = vrot.slane %v1693_v35, %v4307_v15  ;;  %v1708_v42 = vcombine.low %v1676_v58, %v1691_v49  ;;  %3874 = vmatprep.mubr.msk.bf16.mxu0 %vm4180_vm0, %v4179_v39  ;;  %v1709_v30 = vcombine.high %v1676_v58, %v1691_v49 }
 0x411   :  { %v1835_v24 = vrot.slane %v1828_v34, %v4294_v59  ;;  %v1843_v63 = vrot.slane %v3697_v2, %v4294_v59  ;;  %v1844_v21 = vcombine.low %v1650_v18, %v1657_v60  ;;  %3884 = vmatprep.subr.bf16.mxu0 %v4179_v39  ;;  %v3698_v11 = vcombine.high %v1650_v18, %v1657_v60 }
 0x412   :  { %v1716_v5 = vrot.slane %v1708_v42, %v4307_v15  ;;  %v1878_v14 = vcombine.low %v1700_v9, %v1707_v52  ;;  %v3699_v28 = vcombine.high %v1700_v9, %v1707_v52  ;;  %v1723_v32 = vrot.slane %v1709_v30, %v4307_v15  ;;  %v4060_v61 = vpop.eup %4059 }
 0x413   :  { %v1851_v29 = vrot.slane %v1844_v21, %v4294_v59  ;;  %v1859_v40 = vrot.slane %v3698_v11, %v4294_v59  ;;  %v2544_v47 = vpack.c.bf16 %v2532_v22, %v2531_v7  ;;  %v1860_v25 = vcombine.low %v1835_v24, %v1843_v63  ;;  %v4062_v53 = vpop.eup %4061 }
 0x414   :  { %v1885_v36 = vrot.slane %v1878_v14, %v4294_v59  ;;  %v1893_v41 = vrot.slane %v3699_v28, %v4294_v59  ;;  %v1894_v43 = vcombine.low %v1716_v5, %v1723_v32  ;;  %v3700_v23 = vcombine.high %v1716_v5, %v1723_v32  ;;  %v4064_v34 = vpop.eup %4063 }
 0x415   :  { %v1868_v44 = vcombine.low %v1851_v29, %v1859_v40  ;;  %v1867_v50 = vrot.slane %v1860_v25, %v4307_v15  ;;  %v2536_v20 = vmul.f32 %v4060_v61, %v4746_v54  ;;  %v2535_v33 = vmul.f32 %v4062_v53, %v4740_v13  ;;  %v2502_v54 = vpop.xlane.xlu0 %2501 }
 0x416   :  { %3875 = vmatmul.mubr.msk.bf16.vlgmr.msra.gmra.mrb[32].mxu0 %vm2364_vm3, %v2544_v47  ;;  %v1901_v57 = vrot.slane %v1894_v43, %v4294_v59  ;;  %v1909_v37 = vrot.slane %v3700_v23, %v4294_v59  ;;  %v1910_v45 = vcombine.low %v1885_v36, %v1893_v41  ;;  %v2533_v22 = vmul.f32 %v4064_v34, %v4731_v48 }
 0x417   :  { %3886 = vmatprep.mubr.msk.bf16.mxu0 %vm4180_vm0, %v4179_v39  ;;  %v1875_v4 = vrot.slane %v1868_v44, %v4307_v15  ;;  %v2546_v49 = vpack.c.bf16 %v2536_v20, %v2535_v33 }
 0x418   :  { %v1918_v12 = vcombine.low %v1901_v57, %v1909_v37  ;;  %v1917_v55 = vrot.slane %v1910_v45, %v4307_v15 }
 0x419   :  { %v1876_v27 = vcombine.low %v1867_v50, %v1875_v4  ;;  %v1877_v1 = vcombine.high %v1867_v50, %v1875_v4  ;;  %v2508_v13 = vpop.xlane.xlu0 %2507 }
 0x41a   :  { %v1925_v31 = vrot.slane %v1918_v12, %v4307_v15 }
 0x41b   :  { %v1948_v10 = vshrl.u32 %v1876_v27, 16  ;;  %v1956_v7 = vshrl.u32 %v1877_v1, 16 }
 0x41c   :  { %v1926_v51 = vcombine.low %v1917_v55, %v1925_v31  ;;  %v1927_v38 = vcombine.high %v1917_v55, %v1925_v31 }
 0x41e   :  { %v1946_v58 = vpack.i.b16 %v1926_v51, %v1876_v27  ;;  %v1949_v46 = vshrl.u32 %v1926_v51, 16  ;;  %v1957_v3 = vshrl.u32 %v1927_v38, 16  ;;  %v1954_v17 = vpack.i.b16 %v1927_v38, %v1877_v1 }
 0x420   :  { %3879 = vmatpush3.bf16.msra.mxu1 %v1946_v58  ;;  %v1950_v62 = vpack.i.b16 %v1949_v46, %v1948_v10  ;;  %v1958_v6 = vpack.i.b16 %v1957_v3, %v1956_v7 }
 0x421   :  { %3890 = vmatprep.subr.bf16.mxu1 %v4179_v39 }
 0x422   :  { %3885 = vmatpush3.bf16.msra.mxu0 %v1950_v62 }
 0x423   :  { %3896 = vmatprep.subr.bf16.mxu0 %v4179_v39 }
 0x425   :  { %3887 = vmatmul.mubr.msk.bf16.vlgmr.msra.gmra.mrb[36].mxu0 %vm2364_vm3, %v2546_v49 }
 0x426   :  { %3897 = vmatpush3.bf16.msra.mxu0 %v1958_v6  ;;  %3898 = vmatprep.mubr.msk.bf16.mxu0 %vm4180_vm0, %v4179_v39 }
 0x437   :  { %v2490_v35 = vpop.xlane.xlu1 %2489 }
 0x438   :  { %4065 = vrcp.f32 %v2490_v35 }
 0x43b   :  { %v2499_v18 = vpop.xlane.xlu1 %2498 }
 0x43c   :  { %4067 = vrcp.f32 %v2499_v18 }
 0x43d   :  { %4069 = vrcp.f32 %v2502_v54 }
 0x43e   :  { %4071 = vrcp.f32 %v2508_v13 }
 0x43f   :  { %v2505_v60 = vpop.xlane.xlu1 %2504 }
 0x440   :  { %4073 = vrcp.f32 %v2505_v60 }
 0x442   :  { %v4066_v2 = vpop.eup %4065 }
 0x443   :  { %v2534_v9 = vmul.f32 %v4066_v2, %v4772_v56 }
 0x445   :  { %v2545_v52 = vpack.c.bf16 %v2534_v9, %v2533_v22 }
 0x446   :  { %v4068_v42 = vpop.eup %4067 }
 0x447   :  { %v4070_v30 = vpop.eup %4069  ;;  %3881 = vmatmul.mubr.msk.bf16.vlgmr.msra.gmra.mrb[24].mxu1 %vm2364_vm3, %v2545_v52  ;;  %v2537_v24 = vmul.f32 %v4068_v42, %v4790_v16 }
 0x448   :  { %v4072_v26 = vpop.eup %4071  ;;  %3891 = vmatpush3.bf16.msra.mxu1 %v1954_v17  ;;  %3892 = vmatprep.mubr.msk.bf16.mxu1 %vm4180_vm0, %v4179_v39  ;;  %v2538_v21 = vmul.f32 %v4070_v30, %v4750_v0 }
 0x449   :  { %v2540_v48 = vmul.f32 %v4072_v26, %v4754_v19 }
 0x44a   :  { %v4074_v63 = vpop.eup %4073  ;;  %v2547_v5 = vpack.c.bf16 %v2538_v21, %v2537_v24 }
 0x44b   :  { %v2539_v56 = vmul.f32 %v4074_v63, %v4798_v8 }
 0x44d   :  { %v2548_v11 = vpack.c.bf16 %v2540_v48, %v2539_v56 }
 0x44f   :  { %3893 = vmatmul.mubr.msk.bf16.vlgmr.msra.gmra.mrb[28].mxu1 %vm2364_vm3, %v2547_v5  ;;  %3899 = vmatmul.mubr.msk.bf16.vlgmr.msra.gmra.mrb[40].mxu0 %vm2364_vm3, %v2548_v11 }
 0x4d1   :  { %v2586_v14 = vpop.f32.mrb[16].mxu1 }
 0x4d2   :  { %v3858_v28 = vpop.f32.mrb[17].mxu1 }
 0x4d3   :  { %v2589_v32 = vpop.f32.mrb[18].mxu1 }
 0x4d4   :  { %v3859_v29 = vpop.f32.mrb[19].mxu1 }
 0x4dd   :  { %v2674_v39 = vpop.f32.mrb[20].mxu1 }
 0x4de   :  { %v2901_v40 = vcombine.low %v2586_v14, %v2674_v39  ;;  %v2902_v16 = vcombine.high %v2586_v14, %v2674_v39  ;;  %v3870_v36 = vpop.f32.mrb[21].mxu1 }
 0x4df   :  { %v2677_v41 = vpop.f32.mrb[22].mxu1 }
 0x4e0   :  { %v2969_v0 = vcombine.low %v2589_v32, %v2677_v41  ;;  %v2970_v47 = vcombine.high %v2589_v32, %v2677_v41  ;;  %v3871_v19 = vpop.f32.mrb[23].mxu1  ;;  %v2909_v4 = vrot.slane %v2901_v40, %v4294_v59  ;;  %v2916_v50 = vrot.slane %v2902_v16, %v4294_v59 }
 0x4e1   :  { %v2630_v43 = vpop.f32.mrb[28].mxu0 }
 0x4e2   :  { %v3864_v8 = vpop.f32.mrb[29].mxu0  ;;  %v2977_v46 = vrot.slane %v2969_v0, %v4294_v59  ;;  %v2984_v1 = vrot.slane %v2970_v47, %v4294_v59 }
 0x4e3   :  { %v2633_v23 = vpop.f32.mrb[30].mxu0 }
 0x4e4   :  { %v3865_v25 = vpop.f32.mrb[31].mxu0 }
 0x4e9   :  { %v2718_v44 = vpop.f32.mrb[32].mxu0 }
 0x4ea   :  { %v2917_v57 = vcombine.low %v2630_v43, %v2718_v44  ;;  %v2918_v37 = vcombine.high %v2630_v43, %v2718_v44  ;;  %v3876_v45 = vpop.f32.mrb[33].mxu0 }
 0x4eb   :  { %v2721_v12 = vpop.f32.mrb[34].mxu0 }
 0x4ec   :  { %v2925_v27 = vrot.slane %v2917_v57, %v4294_v59  ;;  %v2932_v55 = vrot.slane %v2918_v37, %v4294_v59  ;;  %v2985_v31 = vcombine.low %v2633_v23, %v2721_v12  ;;  %v2986_v61 = vcombine.high %v2633_v23, %v2721_v12  ;;  %v3877_v51 = vpop.f32.mrb[35].mxu0 }
 0x4ee   :  { %v2933_v38 = vcombine.low %v2909_v4, %v2925_v27  ;;  %v2934_v53 = vcombine.high %v2909_v4, %v2925_v27  ;;  %v2949_v58 = vcombine.low %v2916_v50, %v2932_v55  ;;  %v2950_v10 = vcombine.high %v2916_v50, %v2932_v55  ;;  %v4003_v4 = vld [vmem:[#allocation7] sm:$0xff]   ;;  %v4004_v50 = vld [vmem:[#allocation7 + $0x8] sm:$0xff]  }
 0x4ef   :  { %v2993_v20 = vrot.slane %v2985_v31, %v4294_v59  ;;  %v3000_v62 = vrot.slane %v2986_v61, %v4294_v59  ;;  %3902 = vmatprep.subr.bf16.mxu1 %v4003_v4 }
 0x4f0   :  { %v2941_v3 = vrot.slane %v2933_v38, %v4307_v15  ;;  %v2948_v33 = vrot.slane %v2934_v53, %v4307_v15  ;;  %v2957_v7 = vrot.slane %v2949_v58, %v4307_v15  ;;  %v2964_v49 = vrot.slane %v2950_v10, %v4307_v15  ;;  %3903 = vmatpush3.bf16.msra.mxu1 %v4003_v4 }
 0x4f1   :  { %v3001_v6 = vcombine.low %v2977_v46, %v2993_v20  ;;  %v3002_v54 = vcombine.high %v2977_v46, %v2993_v20  ;;  %v3017_v35 = vcombine.low %v2984_v1, %v3000_v62  ;;  %v3018_v13 = vcombine.high %v2984_v1, %v3000_v62  ;;  %3904 = vmatprep.subr.bf16.mxu1 %v4004_v50  ;;  %v4005_v46 = vld [vmem:[#allocation7 + $0x10] sm:$0xff]  }
 0x4f2   :  { %v3173_v18 = vcombine.low %v2941_v3, %v2948_v33  ;;  %v3717_v60 = vcombine.high %v2941_v3, %v2948_v33  ;;  %v3189_v34 = vcombine.low %v2957_v7, %v2964_v49  ;;  %v3718_v2 = vcombine.high %v2957_v7, %v2964_v49  ;;  %v4006_v3 = vld [vmem:[#allocation7 + $0x18] sm:$0xff]   ;;  %v4007_v33 = vld [vmem:[#allocation7 + $0x20] sm:$0xff]   ;;  %v4008_v7 = vld [vmem:[#allocation7 + $0x28] sm:$0xff]  }
 0x4f3   :  { %v3009_v22 = vrot.slane %v3001_v6, %v4307_v15  ;;  %v3016_v9 = vrot.slane %v3002_v54, %v4307_v15  ;;  %v3025_v52 = vrot.slane %v3017_v35, %v4307_v15  ;;  %v3032_v42 = vrot.slane %v3018_v13, %v4307_v15 }
 0x4f4   :  { %v3180_v17 = vrot.slane %v3173_v18, %v4294_v59  ;;  %v3188_v30 = vrot.slane %v3717_v60, %v4294_v59  ;;  %v3196_v26 = vrot.slane %v3189_v34, %v4294_v59  ;;  %v3204_v24 = vrot.slane %v3718_v2, %v4294_v59  ;;  %3905 = vmatpush3.bf16.msra.mxu1 %v4004_v50 }
 0x4f5   :  { %v3241_v63 = vcombine.low %v3009_v22, %v3016_v9  ;;  %v3719_v21 = vcombine.high %v3009_v22, %v3016_v9  ;;  %v3257_v48 = vcombine.low %v3025_v52, %v3032_v42  ;;  %v3720_v56 = vcombine.high %v3025_v52, %v3032_v42  ;;  %3906 = vmatprep.subr.bf16.mxu1 %v4005_v46 }
 0x4f6   :  { %v3205_v5 = vcombine.low %v3180_v17, %v3188_v30  ;;  %v3221_v11 = vcombine.low %v3196_v26, %v3204_v24  ;;  %v3206_v14 = vcombine.high %v3180_v17, %v3188_v30  ;;  %v3222_v28 = vcombine.high %v3196_v26, %v3204_v24 }
 0x4f7   :  { %v3248_v32 = vrot.slane %v3241_v63, %v4294_v59  ;;  %v3256_v29 = vrot.slane %v3719_v21, %v4294_v59  ;;  %v3264_v39 = vrot.slane %v3257_v48, %v4294_v59  ;;  %v3272_v40 = vrot.slane %v3720_v56, %v4294_v59 }
 0x4f8   :  { %v4917_v16 = vrot.slane %v3205_v5, %v4307_v15  ;;  %v4920_v36 = vrot.slane %v3221_v11, %v4307_v15  ;;  %v3220_v41 = vrot.slane %v3206_v14, %v4307_v15  ;;  %v3236_v0 = vrot.slane %v3222_v28, %v4307_v15  ;;  %v2806_v47 = vpop.f32.mrb[36].mxu0  ;;  %3907 = vmatpush3.bf16.msra.mxu1 %v4005_v46 }
 0x4f9   :  { %v3273_v19 = vcombine.low %v3248_v32, %v3256_v29  ;;  %v3289_v43 = vcombine.low %v3264_v39, %v3272_v40  ;;  %v3274_v8 = vcombine.high %v3248_v32, %v3256_v29  ;;  %v3290_v23 = vcombine.high %v3264_v39, %v3272_v40  ;;  %v3888_v25 = vpop.f32.mrb[37].mxu0  ;;  %3908 = vmatprep.subr.bf16.mxu1 %v4006_v3 }
 0x4fa   :  { %v3237_v44 = vcombine.low %v4917_v16, %v4920_v36  ;;  %v3238_v57 = vcombine.high %v4917_v16, %v4920_v36  ;;  %v3239_v37 = vcombine.low %v3220_v41, %v3236_v0  ;;  %v3240_v45 = vcombine.high %v3220_v41, %v3236_v0  ;;  %v4928_v12 = vpop.f32.mrb[38].mxu0 }
 0x4fb   :  { %v4931_v27 = vrot.slane %v3273_v19, %v4307_v15  ;;  %v4934_v55 = vrot.slane %v3289_v43, %v4307_v15  ;;  %v3288_v31 = vrot.slane %v3274_v8, %v4307_v15  ;;  %v3304_v61 = vrot.slane %v3290_v23, %v4307_v15  ;;  %v3889_v51 = vpop.f32.mrb[39].mxu0 }
 0x4fc   :  { %3909 = vmatpush3.bf16.msra.mxu1 %v4006_v3 }
 0x4fd   :  { %v3306_v38 = vcombine.high %v4931_v27, %v4934_v55  ;;  %v3305_v53 = vcombine.low %v4931_v27, %v4934_v55  ;;  %v3307_v58 = vcombine.low %v3288_v31, %v3304_v61  ;;  %v3308_v10 = vcombine.high %v3288_v31, %v3304_v61  ;;  %3910 = vmatprep.subr.bf16.mxu1 %v4007_v33  ;;  %v3725_v27 = vld [vmem:[%s5013_s3] ss:$0 sm:$0xff] }
 0x4ff   :  { %v3939_v1 = vpack.i.bf16 %v3306_v38, %v3238_v57  ;;  %v3944_v20 = vpack.i.bf16 %v3307_v58, %v3239_v37  ;;  %v4942_v62 = vpack.i.bf16 %v3308_v10, %v3240_v45 }
 0x500   :  { %3911 = vmatpush3.bf16.msra.mxu1 %v4007_v33 }
 0x501   :  { %3940 = vrot.lane.b32.xlu1 %v3939_v1, %s4177_s2  ;;  %3912 = vmatprep.subr.bf16.mxu1 %v4008_v7 }
 0x504   :  { %3913 = vmatpush3.bf16.msra.mxu1 %v4008_v7 }
 0x505   :  { %3945 = vrot.lane.b32.xlu1 %v3944_v20, %s4173_s1 }
 0x51a   :  { %v2762_v49 = vpop.f32.mrb[24].mxu1 }
 0x51b   :  { %v3882_v6 = vpop.f32.mrb[25].mxu1 }
 0x51c   :  { %v2765_v54 = vpop.f32.mrb[26].mxu1 }
 0x51d   :  { %v3883_v35 = vpop.f32.mrb[27].mxu1 }
 0x522   :  { %v2850_v13 = vpop.f32.mrb[28].mxu1  ;;  %v2894_v18 = vpop.f32.mrb[40].mxu0 }
 0x523   :  { %v3037_v60 = vcombine.low %v2762_v49, %v2850_v13  ;;  %v3038_v34 = vcombine.high %v2762_v49, %v2850_v13  ;;  %v3053_v2 = vcombine.low %v2806_v47, %v2894_v18  ;;  %v3054_v22 = vcombine.high %v2806_v47, %v2894_v18  ;;  %v3894_v9 = vpop.f32.mrb[29].mxu1  ;;  %v3900_v52 = vpop.f32.mrb[41].mxu0  ;;  %v4009_v18 = vld [vmem:[#allocation7 + $0x30] sm:$0xff]  }
 0x524   :  { %v2853_v42 = vpop.f32.mrb[30].mxu1  ;;  %v2897_v17 = vpop.f32.mrb[42].mxu0  ;;  %3914 = vmatprep.subr.bf16.mxu1 %v4009_v18 }
 0x525   :  { %v3045_v30 = vrot.slane %v3037_v60, %v4294_v59  ;;  %v3052_v26 = vrot.slane %v3038_v34, %v4294_v59  ;;  %v3061_v24 = vrot.slane %v3053_v2, %v4294_v59  ;;  %v3068_v63 = vrot.slane %v3054_v22, %v4294_v59  ;;  %v3895_v21 = vpop.f32.mrb[31].mxu1  ;;  %v3901_v48 = vpop.f32.mrb[43].mxu0  ;;  %3915 = vmatpush3.bf16.msra.mxu1 %v4009_v18 }
 0x526   :  { %v3105_v56 = vcombine.low %v2765_v54, %v2853_v42  ;;  %v3106_v5 = vcombine.high %v2765_v54, %v2853_v42  ;;  %v3121_v11 = vcombine.low %v4928_v12, %v2897_v17  ;;  %v3122_v14 = vcombine.high %v4928_v12, %v2897_v17 }
 0x527   :  { %v3069_v28 = vcombine.low %v3045_v30, %v3061_v24  ;;  %v3070_v32 = vcombine.high %v3045_v30, %v3061_v24  ;;  %v3085_v29 = vcombine.low %v3052_v26, %v3068_v63  ;;  %v3086_v39 = vcombine.high %v3052_v26, %v3068_v63 }
 0x528   :  { %v3113_v40 = vrot.slane %v3105_v56, %v4294_v59  ;;  %v3120_v41 = vrot.slane %v3106_v5, %v4294_v59  ;;  %v3129_v0 = vrot.slane %v3121_v11, %v4294_v59  ;;  %v3136_v47 = vrot.slane %v3122_v14, %v4294_v59 }
 0x529   :  { %v3077_v19 = vrot.slane %v3069_v28, %v4307_v15  ;;  %v3084_v43 = vrot.slane %v3070_v32, %v4307_v15  ;;  %v3093_v8 = vrot.slane %v3085_v29, %v4307_v15  ;;  %v3100_v23 = vrot.slane %v3086_v39, %v4307_v15  ;;  %v4010_v32 = vld [vmem:[#allocation7 + $0x38] sm:$0xff]  }
 0x52a   :  { %v3137_v25 = vcombine.low %v3113_v40, %v3129_v0  ;;  %v3138_v57 = vcombine.high %v3113_v40, %v3129_v0  ;;  %v3153_v37 = vcombine.low %v3120_v41, %v3136_v47  ;;  %v3154_v45 = vcombine.high %v3120_v41, %v3136_v47  ;;  %3916 = vmatprep.subr.bf16.mxu1 %v4010_v32 }
 0x52b   :  { %v3309_v4 = vcombine.low %v3077_v19, %v3084_v43  ;;  %v3721_v50 = vcombine.high %v3077_v19, %v3084_v43  ;;  %v3325_v12 = vcombine.low %v3093_v8, %v3100_v23  ;;  %v3722_v31 = vcombine.high %v3093_v8, %v3100_v23  ;;  %3917 = vmatpush3.bf16.msra.mxu1 %v4010_v32 }
 0x52c   :  { %v3145_v61 = vrot.slane %v3137_v25, %v4307_v15  ;;  %v3152_v51 = vrot.slane %v3138_v57, %v4307_v15  ;;  %v3161_v38 = vrot.slane %v3153_v37, %v4307_v15  ;;  %v3168_v58 = vrot.slane %v3154_v45, %v4307_v15 }
 0x52d   :  { %v3316_v10 = vrot.slane %v3309_v4, %v4294_v59  ;;  %v3324_v46 = vrot.slane %v3721_v50, %v4294_v59  ;;  %v3332_v1 = vrot.slane %v3325_v12, %v4294_v59  ;;  %v3340_v20 = vrot.slane %v3722_v31, %v4294_v59 }
 0x52e   :  { %v3377_v3 = vcombine.low %v3145_v61, %v3152_v51  ;;  %v3723_v33 = vcombine.high %v3145_v61, %v3152_v51  ;;  %v3393_v7 = vcombine.low %v3161_v38, %v3168_v58  ;;  %v3724_v49 = vcombine.high %v3161_v38, %v3168_v58 }
 0x52f   :  { %v3342_v6 = vcombine.high %v3316_v10, %v3324_v46  ;;  %v3358_v54 = vcombine.high %v3332_v1, %v3340_v20  ;;  %v3341_v35 = vcombine.low %v3316_v10, %v3324_v46  ;;  %v3357_v13 = vcombine.low %v3332_v1, %v3340_v20 }
 0x530   :  { %v3384_v60 = vrot.slane %v3377_v3, %v4294_v59  ;;  %v3392_v34 = vrot.slane %v3723_v33, %v4294_v59  ;;  %v3400_v2 = vrot.slane %v3393_v7, %v4294_v59  ;;  %v3408_v22 = vrot.slane %v3724_v49, %v4294_v59 }
 0x531   :  { %v3356_v9 = vrot.slane %v3342_v6, %v4307_v15  ;;  %v3372_v52 = vrot.slane %v3358_v54, %v4307_v15  ;;  %v3349_v42 = vrot.slane %v3341_v35, %v4307_v15  ;;  %v3365_v17 = vrot.slane %v3357_v13, %v4307_v15 }
 0x532   :  { %v3410_v30 = vcombine.high %v3384_v60, %v3392_v34  ;;  %v3426_v26 = vcombine.high %v3400_v2, %v3408_v22  ;;  %v3409_v24 = vcombine.low %v3384_v60, %v3392_v34  ;;  %v3425_v63 = vcombine.low %v3400_v2, %v3408_v22 }
 0x533   :  { %v3375_v21 = vcombine.low %v3356_v9, %v3372_v52  ;;  %v3373_v48 = vcombine.low %v3349_v42, %v3365_v17  ;;  %v3374_v56 = vcombine.high %v3349_v42, %v3365_v17  ;;  %v3376_v5 = vcombine.high %v3356_v9, %v3372_v52 }
 0x534   :  { %v3424_v59 = vrot.slane %v3410_v30, %v4307_v15  ;;  %v3440_v11 = vrot.slane %v3426_v26, %v4307_v15  ;;  %v3417_v14 = vrot.slane %v3409_v24, %v4307_v15  ;;  %v3433_v28 = vrot.slane %v3425_v63, %v4307_v15 }
 0x536   :  { %v3443_v29 = vcombine.low %v3424_v59, %v3440_v11  ;;  %v3442_v39 = vcombine.high %v3417_v14, %v3433_v28  ;;  %v3441_v40 = vcombine.low %v3417_v14, %v3433_v28  ;;  %v3444_v41 = vcombine.high %v3424_v59, %v3440_v11 }
 0x538   :  { %v3954_v0 = vpack.i.bf16 %v3443_v29, %v3375_v21  ;;  %v3949_v47 = vpack.i.bf16 %v3442_v39, %v3374_v56  ;;  %v3964_v19 = vpack.i.bf16 %v3444_v41, %v3376_v5 }
 0x53a   :  { %3955 = vrot.lane.b32.xlu1 %v3954_v0, %s4173_s1  ;;  %3950 = vrot.lane.b32.xlu0 %v3949_v47, %s4177_s2 }
 0x53e   :  { %3965 = vrot.lane.b32.xlu1 %v3964_v19, %s4178_s27  ;;  %3960 = vrot.lane.b32.xlu0 %v4942_v62, %s4178_s27 }
 0x573   :  { %v3941_v15 = vpop.permute.xlu1 %3940 }
 0x574   :  { %v3943_v8 = vunpack.i.h.bf16 %v3941_v15  ;;  %v3942_v23 = vunpack.i.l.bf16 %v3941_v15 }
 0x576   :  { %v3493_v62 = vsel %vm1960_vm1, %v3237_v44, %v3942_v23  ;;  %v3494_v38 = vsel %vm1960_vm1, %v3305_v53, %v3943_v8 }
 0x577   :  { %v3946_v43 = vpop.permute.xlu1 %3945 }
 0x578   :  { %v3948_v4 = vunpack.i.h.bf16 %v3946_v43  ;;  %v3947_v50 = vunpack.i.l.bf16 %v3946_v43 }
 0x57a   :  { %v3498_v33 = vsel %vm3497_vm5, %v3493_v62, %v3947_v50  ;;  %v3499_v7 = vsel %vm3497_vm5, %v3494_v38, %v3948_v4 }
 0x5ac   :  { %v3956_v25 = vpop.permute.xlu1 %3955  ;;  %v3951_v57 = vpop.permute.xlu0 %3950 }
 0x5ad   :  { %v3953_v37 = vunpack.i.h.bf16 %v3951_v57  ;;  %v3952_v45 = vunpack.i.l.bf16 %v3951_v57  ;;  %v3958_v12 = vunpack.i.h.bf16 %v3956_v25  ;;  %v3957_v31 = vunpack.i.l.bf16 %v3956_v25 }
 0x5af   :  { %v3495_v61 = vsel %vm1960_vm1, %v3373_v48, %v3952_v45  ;;  %v3496_v51 = vsel %vm1960_vm1, %v3441_v40, %v3953_v37 }
 0x5b0   :  { %v3966_v58 = vpop.permute.xlu1 %3965  ;;  %v3961_v10 = vpop.permute.xlu0 %3960  ;;  %v3500_v49 = vsel %vm3497_vm5, %v3495_v61, %v3957_v31  ;;  %v3501_v6 = vsel %vm3497_vm5, %v3496_v51, %v3958_v12 }
 0x5b1   :  { %v3968_v46 = vunpack.i.h.bf16 %v3966_v58  ;;  %v3967_v1 = vunpack.i.l.bf16 %v3966_v58  ;;  %v3963_v20 = vunpack.i.h.bf16 %v3961_v10  ;;  %v3962_v3 = vunpack.i.l.bf16 %v3961_v10 }
 0x5b3   :  { %v3505_v54 = vsel %vm3502_vm6, %v3500_v49, %v3967_v1  ;;  %v3506_v16 = vsel %vm3502_vm6, %v3501_v6, %v3968_v46  ;;  %v3503_v36 = vsel %vm3502_vm6, %v3498_v33, %v3962_v3  ;;  %v3504_v44 = vsel %vm3502_vm6, %v3499_v7, %v3963_v20 }
 0x5b4   :  { %v3508_v35 = vpack.c.bf16 %v3506_v16, %v3505_v54  ;;  %v3507_v13 = vpack.c.bf16 %v3504_v44, %v3503_v36 }
 0x5b6   :  { %3918 = vmatprep.mubr.bf16.mxu1 %v3507_v13 }
 0x5b7   :  { %3919 = vmatmul.mubr.bf16.vlgmr.msra.gmra.mrb[32].mxu1 %v3508_v35 }
 0x68a   :  { %v3920_v55 = vpop.f32.mrb[32].mxu1 }
 0x68b   :  { %v3623_v53 = vadd.f32 %v3920_v55, %v3725_v27  ;;  %v3614_v18 = vpop.f32.mrb[33].mxu1 }
 0x68c   :  { %v3615_v60 = vadd.f32 %v3725_v27, %v3614_v18  ;;  %v3921_v34 = vpop.f32.mrb[34].mxu1 }
 0x68d   :  { %3631 = vst [vmem:[#allocation8 + $0x10] sm:$0xff] %v3623_v53  ;;  %v3626_v2 = vadd.f32 %v3921_v34, %v3725_v27  ;;  %v3617_v22 = vpop.f32.mrb[35].mxu1 }
 0x68e   :  { %3629 = vst [vmem:[#allocation8] sm:$0xff] %v3615_v60  ;;  %v3618_v9 = vadd.f32 %v3725_v27, %v3617_v22 }
 0x68f   :  { %3632 = vst [vmem:[#allocation8 + $0x18] sm:$0xff] %v3626_v2 }
 0x690   :  { %3630 = vst [vmem:[#allocation8 + $0x8] sm:$0xff] %v3618_v9 }
 0x691   :  { %4152 = shalt.err (!%p4149_p0)
}
 0x692   :  { %s4153_s8 = scalar_lea.hbm %s5014_s4, 512 }
 0x693   :  { %p4154_p1 = scmp.ne.s32.totalorder %s5014_s4, %s4153_s8  ;;  %p4157_p2 = scmp.lt.u32.totalorder %s4153_s8, %s5014_s4 }
 0x695   :  { %p4159_p3 = pnand %p4157_p2, %p4154_p1 }
 0x697   :  { %4162 = shalt.err (!%p4159_p3)
}
 0x698   :  { %s4184_s1 = smov 128   ;;  %s4185_s13 = smov 8  }
 0x699   :  { %3644 = dma.vmem_to_hbm [thread:$0]  %s3639_s5, 512, %s5014_s4, [#allocation4], %s4184_s1, %s4184_s1, %s4185_s13  }
 0x69a   :  { %4167 = dma.done.wait [#allocation4], 512  }
 0x69b   :  { %4168 = vsyncadd [#allocation4], 4294966784 }
 0x69c   :  { %3648 = vsyncpa [#allocation3], 1 }
 0x69d   :  { %3649 = vsyncpa [#allocation6], 1 }
 0x69e   :  { %3650 = vsyncpa [#allocation4], 1 }

</bundles_post_ra>
